<compile_context>
chip_gen: v6e
topology: v6e:2x2x1
jax: 0.10.0
libtpu: 0.0.40
codegen_flags: <defaults>
</compile_context>

<pallas_src>
import functools

import jax
import jax.numpy as jnp
from jax.experimental import pallas as pl
from jax.experimental.pallas import tpu as pltpu


# ----------------------------------------------------------------------------
# Fused kernel: all LSTM layers + Linear head, one time chunk per grid step
# ----------------------------------------------------------------------------
def _fused_lstm_kernel(
    x_ref,        # (TT, B, F_in)        input chunk (time-major)
    wih0_ref,     # (F_in, 4H)           layer-0 input weights   [param dtype]
    b0_ref,       # (1, 4H)              layer-0 bias (b_ih+b_hh) f32
    wih_r_ref,    # (Lr, H, 4H)          layers>=1 input weights [param dtype]
    b_r_ref,      # (Lr, 1, 4H)          layers>=1 biases         f32
    whh_ref,      # (L, H, 4H)           recurrent weights       [param dtype]
    wout_ref,     # (H, F_out)           Linear head weights      f32
    bout_ref,     # (1, F_out)           Linear head bias         f32
    out_ref,      # (B, F_out)           model output
    gx_scr,       # (TT, B, 4H) f32      per-chunk input-projected gates
    hseq_scr,     # (TT, B, H)  f32      inter-layer hidden sequence (chunk)
    h_scr,        # (L, B, H)   f32      persistent hidden carry
    c_scr,        # (L, B, H)   f32      persistent cell carry
    *,
    n_layers,
    hidden,       # padded hidden size H
    time_chunk,
    unroll,
):
    c_idx = pl.program_id(0)
    n_chunks = pl.num_programs(0)
    TT = time_chunk
    H = hidden
    B = x_ref.shape[1]
    wdtype = whh_ref.dtype

    # Zero the persistent carries on the first time chunk.
    @pl.when(c_idx == 0)
    def _():
        h_scr[...] = jnp.zeros_like(h_scr)
        c_scr[...] = jnp.zeros_like(c_scr)

    def recurrence(layer, write_hseq):
        """Run TT LSTM steps for `layer`, reading gx_scr, updating h/c carry."""
        whh = whh_ref[layer]  # (H, 4H), static layer index

        def step(tt, carry):
            h, c = carry
            gates = gx_scr[tt] + jnp.dot(
                h.astype(wdtype), whh, preferred_element_type=jnp.float32)
            # Lane-aligned gate slices (H is a multiple of 128). Gate math f32.
            i_g = jax.nn.sigmoid(gates[:, 0 * H:1 * H])
            f_g = jax.nn.sigmoid(gates[:, 1 * H:2 * H])
            g_g = jnp.tanh(gates[:, 2 * H:3 * H])
            o_g = jax.nn.sigmoid(gates[:, 3 * H:4 * H])
            c_new = f_g * c + i_g * g_g
            h_new = o_g * jnp.tanh(c_new)
            if write_hseq:
                hseq_scr[tt] = h_new
            return (h_new, c_new)

        h, c = jax.lax.fori_loop(
            0, TT, step, (h_scr[layer], c_scr[layer]), unroll=unroll)
        h_scr[layer] = h
        c_scr[layer] = c
        return h

    # ---- layer 0: project the raw input chunk (one MXU matmul per chunk) ----
    F_in = x_ref.shape[2]
    x2 = x_ref[...].reshape(TT * B, F_in).astype(wdtype)
    gx = jnp.dot(x2, wih0_ref[...], preferred_element_type=jnp.float32) + b0_ref[...]
    gx_scr[...] = gx.reshape(TT, B, 4 * H)
    h_last = recurrence(0, write_hseq=(n_layers > 1))

    # ---- layers 1..L-1: project the previous layer's chunk hseq in VMEM ----
    for l in range(1, n_layers):
        h2 = hseq_scr[...].reshape(TT * B, H).astype(wdtype)
        gx = jnp.dot(h2, wih_r_ref[l - 1],
                     preferred_element_type=jnp.float32) + b_r_ref[l - 1]
        gx_scr[...] = gx.reshape(TT, B, 4 * H)
        h_last = recurrence(l, write_hseq=(l < n_layers - 1))

    # ---- fused Linear head on the final hidden state of the last layer ----
    # Note: out_ref's block index is constant, so HBM writeback happens once
    # at grid end; the block is only ever written here (last chunk).
    @pl.when(c_idx == n_chunks - 1)
    def _():
        out_ref[...] = (
            jnp.dot(h_last, wout_ref[...], preferred_element_type=jnp.float32)
            + bout_ref[...]
        ).astype(out_ref.dtype)


# ----------------------------------------------------------------------------
# Static helpers
# ----------------------------------------------------------------------------
def _round_up(x, m):
    return ((x + m - 1) // m) * m


def _pick_time_chunk(t, target=64):
    """Largest divisor of T that is <= target (amortizes per-grid-step cost)."""
    for c in range(min(t, target), 0, -1):
        if t % c == 0:
            return c
    return t


def _vmem_bytes_estimate(tc, B, F_in, H, L, Lr, F_out, wbytes):
    G = 4 * H
    f32 = 4
    total = 0
    total += 2 * tc * B * F_in * f32      # x block (double-buffered)
    total += 2 * F_in * G * wbytes        # wih0
    total += 2 * G * f32                  # b0
    total += 2 * Lr * H * G * wbytes      # wih_rest
    total += 2 * Lr * G * f32             # b_rest
    total += 2 * L * H * G * wbytes       # whh
    total += 2 * H * F_out * f32          # wout
    total += 2 * F_out * f32              # bout
    total += 2 * B * F_out * f32          # out block
    total += tc * B * G * f32             # gx scratch
    total += tc * B * H * f32             # hseq scratch
    total += 2 * L * B * H * f32          # h/c carry
    return total


# ----------------------------------------------------------------------------
# Forward
# ----------------------------------------------------------------------------
@functools.partial(jax.jit, static_argnames=("time_chunk",))
def lstm_forward(x, kp, time_chunk=None):
    """x: (batch, seq, features) -> (batch, forecast_length)."""
    B, T, F_in = x.shape
    L, H_pad, G = kp["whh_t"].shape
    Lr = kp["wih_r_t"].shape[0]
    F_out = kp["w_out_t"].shape[1]

    tc = time_chunk if time_chunk is not None else _pick_time_chunk(T)
    assert T % tc == 0, (T, tc)
    B_pad = _round_up(B, 8)

    seq = x
    if B_pad != B:
        seq = jnp.pad(seq, ((0, B_pad - B), (0, 0), (0, 0)))
    # TODO(synk): fold this transpose into the first-layer BlockSpec index_map.
    seq = jnp.transpose(seq, (1, 0, 2))  # (T, B_pad, F_in), time-major

    unroll = min(tc, 8)
    wbytes = jnp.dtype(kp["whh_t"].dtype).itemsize
    est = _vmem_bytes_estimate(tc, B_pad, F_in, H_pad, L, Lr, F_out, wbytes)
    vmem_limit = min(64 * 1024 * 1024, max(32 * 1024 * 1024, int(2 * est)))

    kernel = functools.partial(
        _fused_lstm_kernel,
        n_layers=L, hidden=H_pad, time_chunk=tc, unroll=unroll)

    out = pl.pallas_call(
        kernel,
        out_shape=jax.ShapeDtypeStruct((B_pad, F_out), jnp.float32),
        grid_spec=pltpu.PrefetchScalarGridSpec(
            num_scalar_prefetch=0,
            grid=(T // tc,),
            in_specs=[
                pl.BlockSpec((tc, B_pad, F_in), lambda c: (c, 0, 0)),
                pl.BlockSpec((F_in, G), lambda c: (0, 0)),
                pl.BlockSpec((1, G), lambda c: (0, 0)),
                pl.BlockSpec((Lr, H_pad, G), lambda c: (0, 0, 0)),
                pl.BlockSpec((Lr, 1, G), lambda c: (0, 0, 0)),
                pl.BlockSpec((L, H_pad, G), lambda c: (0, 0, 0)),
                pl.BlockSpec((H_pad, F_out), lambda c: (0, 0)),
                pl.BlockSpec((1, F_out), lambda c: (0, 0)),
            ],
            out_specs=pl.BlockSpec((B_pad, F_out), lambda c: (0, 0)),
            scratch_shapes=[
                pltpu.VMEM((tc, B_pad, G), jnp.float32),       # gx (chunk)
                pltpu.VMEM((tc, B_pad, H_pad), jnp.float32),   # hseq (chunk)
                pltpu.VMEM((L, B_pad, H_pad), jnp.float32),    # h carry
                pltpu.VMEM((L, B_pad, H_pad), jnp.float32),    # c carry
            ],
        ),
        compiler_params=pltpu.CompilerParams(
            dimension_semantics=("arbitrary",),   # recurrence -> sequential
            vmem_limit_bytes=vmem_limit,
        ),
    )(seq, kp["wih0_t"], kp["b0"], kp["wih_r_t"], kp["b_r"],
      kp["whh_t"], kp["w_out_t"], kp["b_out"])

    return out[:B]


# ----------------------------------------------------------------------------
# Parameter init (raw PyTorch layout) and padded/packed kernel params
# ----------------------------------------------------------------------------
def init_params(key, features_count, hidden_size, n_layers, forecast_length):
    """Raw params matching nn.LSTM / nn.Linear shapes (f32)."""
    k = 1.0 / jnp.sqrt(hidden_size)
    layers = []
    for li in range(n_layers):
        in_sz = features_count if li == 0 else hidden_size
        key, k1, k2, k3, k4 = jax.random.split(key, 5)
        layers.append({
            "w_ih": jax.random.uniform(k1, (4 * hidden_size, in_sz), jnp.float32, -k, k),
            "w_hh": jax.random.uniform(k2, (4 * hidden_size, hidden_size), jnp.float32, -k, k),
            "b_ih": jax.random.uniform(k3, (4 * hidden_size,), jnp.float32, -k, k),
            "b_hh": jax.random.uniform(k4, (4 * hidden_size,), jnp.float32, -k, k),
        })
    key, k5, k6 = jax.random.split(key, 3)
    return {
        "layers": layers,
        "w_out": jax.random.uniform(k5, (forecast_length, hidden_size), jnp.float32, -k, k),
        "b_out": jax.random.uniform(k6, (forecast_length,), jnp.float32, -k, k),
    }


def prepare_params(raw, param_dtype=jnp.bfloat16):
    """Pad H->multiple of 128 (gate-blocked), transpose, stack, cast weights."""
    layers = raw["layers"]
    L = len(layers)
    H = layers[0]["w_hh"].shape[1]
    H_pad = _round_up(H, 128)
    G = 4 * H_pad
    F_out = raw["w_out"].shape[0]

    def pad_gate_rows(w):  # (4H, X) -> (4H_pad, X), gate g at rows g*H_pad..
        if H_pad == H:
            return w
        out = jnp.zeros((G, w.shape[1]), w.dtype)
        for g in range(4):
            out = out.at[g * H_pad:g * H_pad + H].set(w[g * H:(g + 1) * H])
        return out

    def pad_gate_vec(v):   # (4H,) -> (4H_pad,)
        if H_pad == H:
            return v
        out = jnp.zeros((G,), v.dtype)
        for g in range(4):
            out = out.at[g * H_pad:g * H_pad + H].set(v[g * H:(g + 1) * H])
        return out

    wih_t_list, b_list, whh_t_list = [], [], []
    for layer in layers:
        w_ih = pad_gate_rows(layer["w_ih"])                       # (G, in)
        w_hh = pad_gate_rows(layer["w_hh"])                       # (G, H)
        w_hh = jnp.pad(w_hh, ((0, 0), (0, H_pad - H)))            # (G, H_pad)
        b = pad_gate_vec(layer["b_ih"] + layer["b_hh"])           # (G,)
        wih_t_list.append(w_ih.T)                                 # (in, G)
        whh_t_list.append(w_hh.T.astype(param_dtype))             # (H_pad, G)
        b_list.append(b.reshape(1, G).astype(jnp.float32))

    wih0_t = wih_t_list[0].astype(param_dtype)                    # (F_in, G)
    b0 = b_list[0]

    if L > 1:
        rest = []
        for l in range(1, L):
            w = jnp.pad(wih_t_list[l], ((0, H_pad - H), (0, 0)))  # (H_pad, G)
            rest.append(w)
        wih_r_t = jnp.stack(rest).astype(param_dtype)             # (L-1, H_pad, G)
        b_r = jnp.stack(b_list[1:])                               # (L-1, 1, G)
    else:
        wih_r_t = jnp.zeros((1, H_pad, G), param_dtype)           # dummy (unused)
        b_r = jnp.zeros((1, 1, G), jnp.float32)

    whh_t = jnp.stack(whh_t_list)                                 # (L, H_pad, G)

    w_out_t = jnp.pad(raw["w_out"], ((0, 0), (0, H_pad - H))).T   # (H_pad, F_out)
    b_out = raw["b_out"].reshape(1, F_out)

    return {
        "wih0_t": wih0_t, "b0": b0,
        "wih_r_t": wih_r_t, "b_r": b_r,
        "whh_t": whh_t,
        "w_out_t": w_out_t.astype(jnp.float32),
        "b_out": b_out.astype(jnp.float32),
    }


# ----------------------------------------------------------------------------
# Pure-JAX reference (PyTorch eval-mode semantics, f32)
# ----------------------------------------------------------------------------
def lstm_forward_ref(x, raw):
    seq = jnp.transpose(x, (1, 0, 2))
    for layer in raw["layers"]:
        H = layer["w_hh"].shape[1]
        wih_t, whh_t = layer["w_ih"].T, layer["w_hh"].T
        b = (layer["b_ih"] + layer["b_hh"])[None, :]

        def step(carry, x_t, wih_t=wih_t, whh_t=whh_t, b=b, H=H):
            h, c = carry
            gates = x_t @ wih_t + h @ whh_t + b
            i = jax.nn.sigmoid(gates[:, 0 * H:1 * H])
            f = jax.nn.sigmoid(gates[:, 1 * H:2 * H])
            g = jnp.tanh(gates[:, 2 * H:3 * H])
            o = jax.nn.sigmoid(gates[:, 3 * H:4 * H])
            c = f * c + i * g
            h = o * jnp.tanh(c)
            return (h, c), h

        B = seq.shape[1]
        init = (jnp.zeros((B, H), jnp.float32), jnp.zeros((B, H), jnp.float32))
        _, seq = jax.lax.scan(step, init, seq)
    return seq[-1] @ raw["w_out"].T + raw["b_out"][None, :]


# ----------------------------------------------------------------------------
if __name__ == "__main__":
    batch, seq_len, features = 2, 8, 4
    hidden, n_layers, forecast = 32, 2, 1

    key = jax.random.PRNGKey(0)
    key, kx = jax.random.split(key)
    x = jax.random.normal(kx, (batch, seq_len, features), jnp.float32)

    raw = init_params(key, features, hidden, n_layers, forecast)
    ref = lstm_forward_ref(x, raw)

    # f32 weights: exact-semantics check (exercises H->128 and B->8 padding and
    # the cross-chunk h/c carry via time_chunk=4 -> 2 chunks).
    p32 = prepare_params(raw, param_dtype=jnp.float32)
    out32 = jax.block_until_ready(lstm_forward(x, p32, time_chunk=4))
    assert out32.shape == (batch, forecast), out32.shape
    assert jnp.allclose(out32, ref, atol=1e-4, rtol=1e-4), (out32, ref)

    # bf16 weights (MXU-friendly path per perf review), f32 accumulation/gates.
    pbf = prepare_params(raw, param_dtype=jnp.bfloat16)
    outbf = jax.block_until_ready(lstm_forward(x, pbf, time_chunk=4))
    assert outbf.shape == (batch, forecast), outbf.shape
    assert jnp.allclose(outbf, ref, atol=5e-2, rtol=5e-2), (outbf, ref)

    print("KERNEL_OK")
</pallas_src>

<mosaic_0001>
module attributes {stable_mosaic.version = 11 : i64} {
  func.func @_fused_lstm_kernel(%arg0: i32, %arg1: memref<4x8x4xf32, #tpu.memory_space<vmem>>, %arg2: memref<4x512xf32, #tpu.memory_space<vmem>>, %arg3: memref<1x512xf32, #tpu.memory_space<vmem>>, %arg4: memref<1x128x512xf32, #tpu.memory_space<vmem>>, %arg5: memref<1x1x512xf32, #tpu.memory_space<vmem>>, %arg6: memref<2x128x512xf32, #tpu.memory_space<vmem>>, %arg7: memref<128x1xf32, #tpu.memory_space<vmem>>, %arg8: memref<1x1xf32, #tpu.memory_space<vmem>>, %arg9: memref<8x1xf32, #tpu.memory_space<vmem>>, %arg10: memref<4x8x512xf32, #tpu.memory_space<vmem>>, %arg11: memref<4x8x128xf32, #tpu.memory_space<vmem>>, %arg12: memref<2x8x128xf32, #tpu.memory_space<vmem>>, %arg13: memref<2x8x128xf32, #tpu.memory_space<vmem>>) attributes {dimension_semantics = [#tpu.dimension_semantics<arbitrary>], iteration_bounds = array<i64: 2>, scalar_prefetch = 0 : i64, scratch_operands = 4 : i64, tpu.core_type = #tpu.core_type<tc>, window_params = [{transform_indices = @transform_0, window_bounds = array<i64: 4, 8, 4>}, {pipeline_mode = #tpu.pipeline_mode<synchronous>, transform_indices = @transform_1, window_bounds = array<i64: 4, 512>}, {pipeline_mode = #tpu.pipeline_mode<synchronous>, transform_indices = @transform_2, window_bounds = array<i64: 1, 512>}, {pipeline_mode = #tpu.pipeline_mode<synchronous>, transform_indices = @transform_3, window_bounds = array<i64: 1, 128, 512>}, {pipeline_mode = #tpu.pipeline_mode<synchronous>, transform_indices = @transform_4, window_bounds = array<i64: 1, 1, 512>}, {pipeline_mode = #tpu.pipeline_mode<synchronous>, transform_indices = @transform_5, window_bounds = array<i64: 2, 128, 512>}, {pipeline_mode = #tpu.pipeline_mode<synchronous>, transform_indices = @transform_6, window_bounds = array<i64: 128, 1>}, {pipeline_mode = #tpu.pipeline_mode<synchronous>, transform_indices = @transform_7, window_bounds = array<i64: 1, 1>}, {pipeline_mode = #tpu.pipeline_mode<synchronous>, transform_indices = @transform_8, window_bounds = array<i64: 8, 1>}]} {
    %c0_i32 = arith.constant 0 : i32
    %0 = arith.cmpi eq, %arg0, %c0_i32 : i32
    %1 = arith.extui %0 : i1 to i32
    %c0_i32_0 = arith.constant 0 : i32
    %2 = arith.cmpi ne, %1, %c0_i32_0 : i32
    scf.if %2 {
      %cst_116 = arith.constant 0.000000e+00 : f32
      %306 = vector.broadcast %cst_116 : f32 to vector<2x8x128xf32>
      %c0_117 = arith.constant 0 : index
      %c0_118 = arith.constant 0 : index
      %c0_119 = arith.constant 0 : index
      %307 = vector.load %arg12[%c0_117, %c0_118, %c0_119] : memref<2x8x128xf32, #tpu.memory_space<vmem>>, vector<2x8x128xf32>
      tpu.vector_store %arg12[%c0_117, %c0_118, %c0_119], %306 {strides = array<i32>} : memref<2x8x128xf32, #tpu.memory_space<vmem>>, vector<2x8x128xf32>,
      %cst_120 = arith.constant 0.000000e+00 : f32
      %308 = vector.broadcast %cst_120 : f32 to vector<2x8x128xf32>
      %c0_121 = arith.constant 0 : index
      %c0_122 = arith.constant 0 : index
      %c0_123 = arith.constant 0 : index
      %309 = vector.load %arg13[%c0_121, %c0_122, %c0_123] : memref<2x8x128xf32, #tpu.memory_space<vmem>>, vector<2x8x128xf32>
      tpu.vector_store %arg13[%c0_121, %c0_122, %c0_123], %308 {strides = array<i32>} : memref<2x8x128xf32, #tpu.memory_space<vmem>>, vector<2x8x128xf32>,
    } else {
    }
    %c0 = arith.constant 0 : index
    %c0_1 = arith.constant 0 : index
    %c0_2 = arith.constant 0 : index
    %3 = vector.load %arg1[%c0, %c0_1, %c0_2] : memref<4x8x4xf32, #tpu.memory_space<vmem>>, vector<4x8x4xf32>
    %4 = vector.shape_cast %3 : vector<4x8x4xf32> to vector<32x4xf32>
    %c0_3 = arith.constant 0 : index
    %c0_4 = arith.constant 0 : index
    %5 = vector.load %arg2[%c0_3, %c0_4] : memref<4x512xf32, #tpu.memory_space<vmem>>, vector<4x512xf32>
    %cst = arith.constant dense<0.000000e+00> : vector<32x512xf32>
    %6 = tpu.matmul %4, %5, %cst {dimension_numbers = #tpu.dot_dimension_numbers<[1], [0], [0], [1], [0, 0, 1, 1], [], []>} : vector<32x4xf32>, vector<4x512xf32>, vector<32x512xf32> -> vector<32x512xf32>
    %c0_5 = arith.constant 0 : index
    %c0_6 = arith.constant 0 : index
    %7 = vector.load %arg3[%c0_5, %c0_6] : memref<1x512xf32, #tpu.memory_space<vmem>>, vector<1x512xf32>
    %8 = vector.broadcast %7 : vector<1x512xf32> to vector<32x512xf32>
    %9 = arith.addf %6, %8 : vector<32x512xf32>
    %10 = vector.shape_cast %9 : vector<32x512xf32> to vector<4x8x512xf32>
    %c0_7 = arith.constant 0 : index
    %c0_8 = arith.constant 0 : index
    %c0_9 = arith.constant 0 : index
    %11 = vector.load %arg10[%c0_7, %c0_8, %c0_9] : memref<4x8x512xf32, #tpu.memory_space<vmem>>, vector<4x8x512xf32>
    tpu.vector_store %arg10[%c0_7, %c0_8, %c0_9], %10 {strides = array<i32>} : memref<4x8x512xf32, #tpu.memory_space<vmem>>, vector<4x8x512xf32>,
    %c0_10 = arith.constant 0 : index
    %c0_11 = arith.constant 0 : index
    %c0_12 = arith.constant 0 : index
    %12 = vector.load %arg6[%c0_10, %c0_11, %c0_12] : memref<2x128x512xf32, #tpu.memory_space<vmem>>, vector<1x128x512xf32>
    %13 = vector.shape_cast %12 : vector<1x128x512xf32> to vector<128x512xf32>
    %c0_13 = arith.constant 0 : index
    %c0_14 = arith.constant 0 : index
    %c0_15 = arith.constant 0 : index
    %14 = vector.load %arg12[%c0_13, %c0_14, %c0_15] : memref<2x8x128xf32, #tpu.memory_space<vmem>>, vector<1x8x128xf32>
    %15 = vector.shape_cast %14 : vector<1x8x128xf32> to vector<8x128xf32>
    %c0_16 = arith.constant 0 : index
    %c0_17 = arith.constant 0 : index
    %c0_18 = arith.constant 0 : index
    %16 = vector.load %arg13[%c0_16, %c0_17, %c0_18] : memref<2x8x128xf32, #tpu.memory_space<vmem>>, vector<1x8x128xf32>
    %17 = vector.shape_cast %16 : vector<1x8x128xf32> to vector<8x128xf32>
    %c0_i32_19 = arith.constant 0 : i32
    %18 = arith.index_cast %c0_i32_19 : i32 to index
    %c0_20 = arith.constant 0 : index
    %c0_21 = arith.constant 0 : index
    %19 = vector.load %arg10[%18, %c0_20, %c0_21] : memref<4x8x512xf32, #tpu.memory_space<vmem>>, vector<1x8x512xf32>
    %20 = vector.shape_cast %19 : vector<1x8x512xf32> to vector<8x512xf32>
    %cst_22 = arith.constant dense<0.000000e+00> : vector<8x512xf32>
    %21 = tpu.matmul %15, %13, %cst_22 {dimension_numbers = #tpu.dot_dimension_numbers<[1], [0], [0], [1], [0, 0, 1, 1], [], []>} : vector<8x128xf32>, vector<128x512xf32>, vector<8x512xf32> -> vector<8x512xf32>
    %22 = arith.addf %20, %21 : vector<8x512xf32>
    %23 = vector.extract_strided_slice %22 {offsets = [0, 0], sizes = [8, 128], strides = [1, 1]} : vector<8x512xf32> to vector<8x128xf32>
    %24 = arith.negf %23 : vector<8x128xf32>
    %25 = math.exp %24 : vector<8x128xf32>
    %cst_23 = arith.constant 1.000000e+00 : f32
    %26 = vector.broadcast %cst_23 : f32 to vector<8x128xf32>
    %27 = arith.addf %26, %25 : vector<8x128xf32>
    %28 = arith.divf %26, %27 : vector<8x128xf32>
    %29 = vector.extract_strided_slice %22 {offsets = [0, 128], sizes = [8, 128], strides = [1, 1]} : vector<8x512xf32> to vector<8x128xf32>
    %30 = arith.negf %29 : vector<8x128xf32>
    %31 = math.exp %30 : vector<8x128xf32>
    %cst_24 = arith.constant 1.000000e+00 : f32
    %32 = vector.broadcast %cst_24 : f32 to vector<8x128xf32>
    %33 = arith.addf %32, %31 : vector<8x128xf32>
    %34 = arith.divf %32, %33 : vector<8x128xf32>
    %35 = vector.extract_strided_slice %22 {offsets = [0, 256], sizes = [8, 128], strides = [1, 1]} : vector<8x512xf32> to vector<8x128xf32>
    %36 = math.tanh %35 : vector<8x128xf32>
    %37 = vector.extract_strided_slice %22 {offsets = [0, 384], sizes = [8, 128], strides = [1, 1]} : vector<8x512xf32> to vector<8x128xf32>
    %38 = arith.negf %37 : vector<8x128xf32>
    %39 = math.exp %38 : vector<8x128xf32>
    %cst_25 = arith.constant 1.000000e+00 : f32
    %40 = vector.broadcast %cst_25 : f32 to vector<8x128xf32>
    %41 = arith.addf %40, %39 : vector<8x128xf32>
    %42 = arith.divf %40, %41 : vector<8x128xf32>
    %43 = arith.mulf %34, %17 : vector<8x128xf32>
    %44 = arith.mulf %28, %36 : vector<8x128xf32>
    %45 = arith.addf %43, %44 : vector<8x128xf32>
    %46 = math.tanh %45 : vector<8x128xf32>
    %47 = arith.mulf %42, %46 : vector<8x128xf32>
    %48 = arith.index_cast %c0_i32_19 : i32 to index
    %c0_26 = arith.constant 0 : index
    %c0_27 = arith.constant 0 : index
    %49 = vector.load %arg11[%48, %c0_26, %c0_27] : memref<4x8x128xf32, #tpu.memory_space<vmem>>, vector<1x8x128xf32>
    %50 = vector.shape_cast %49 : vector<1x8x128xf32> to vector<8x128xf32>
    %51 = vector.shape_cast %47 : vector<8x128xf32> to vector<1x8x128xf32>
    tpu.vector_store %arg11[%48, %c0_26, %c0_27], %51 {strides = array<i32>} : memref<4x8x128xf32, #tpu.memory_space<vmem>>, vector<1x8x128xf32>,
    %c1_i32 = arith.constant 1 : i32
    %52 = arith.index_cast %c1_i32 : i32 to index
    %c0_28 = arith.constant 0 : index
    %c0_29 = arith.constant 0 : index
    %53 = vector.load %arg10[%52, %c0_28, %c0_29] : memref<4x8x512xf32, #tpu.memory_space<vmem>>, vector<1x8x512xf32>
    %54 = vector.shape_cast %53 : vector<1x8x512xf32> to vector<8x512xf32>
    %cst_30 = arith.constant dense<0.000000e+00> : vector<8x512xf32>
    %55 = tpu.matmul %47, %13, %cst_30 {dimension_numbers = #tpu.dot_dimension_numbers<[1], [0], [0], [1], [0, 0, 1, 1], [], []>} : vector<8x128xf32>, vector<128x512xf32>, vector<8x512xf32> -> vector<8x512xf32>
    %56 = arith.addf %54, %55 : vector<8x512xf32>
    %57 = vector.extract_strided_slice %56 {offsets = [0, 0], sizes = [8, 128], strides = [1, 1]} : vector<8x512xf32> to vector<8x128xf32>
    %58 = arith.negf %57 : vector<8x128xf32>
    %59 = math.exp %58 : vector<8x128xf32>
    %cst_31 = arith.constant 1.000000e+00 : f32
    %60 = vector.broadcast %cst_31 : f32 to vector<8x128xf32>
    %61 = arith.addf %60, %59 : vector<8x128xf32>
    %62 = arith.divf %60, %61 : vector<8x128xf32>
    %63 = vector.extract_strided_slice %56 {offsets = [0, 128], sizes = [8, 128], strides = [1, 1]} : vector<8x512xf32> to vector<8x128xf32>
    %64 = arith.negf %63 : vector<8x128xf32>
    %65 = math.exp %64 : vector<8x128xf32>
    %cst_32 = arith.constant 1.000000e+00 : f32
    %66 = vector.broadcast %cst_32 : f32 to vector<8x128xf32>
    %67 = arith.addf %66, %65 : vector<8x128xf32>
    %68 = arith.divf %66, %67 : vector<8x128xf32>
    %69 = vector.extract_strided_slice %56 {offsets = [0, 256], sizes = [8, 128], strides = [1, 1]} : vector<8x512xf32> to vector<8x128xf32>
    %70 = math.tanh %69 : vector<8x128xf32>
    %71 = vector.extract_strided_slice %56 {offsets = [0, 384], sizes = [8, 128], strides = [1, 1]} : vector<8x512xf32> to vector<8x128xf32>
    %72 = arith.negf %71 : vector<8x128xf32>
    %73 = math.exp %72 : vector<8x128xf32>
    %cst_33 = arith.constant 1.000000e+00 : f32
    %74 = vector.broadcast %cst_33 : f32 to vector<8x128xf32>
    %75 = arith.addf %74, %73 : vector<8x128xf32>
    %76 = arith.divf %74, %75 : vector<8x128xf32>
    %77 = arith.mulf %68, %45 : vector<8x128xf32>
    %78 = arith.mulf %62, %70 : vector<8x128xf32>
    %79 = arith.addf %77, %78 : vector<8x128xf32>
    %80 = math.tanh %79 : vector<8x128xf32>
    %81 = arith.mulf %76, %80 : vector<8x128xf32>
    %82 = arith.index_cast %c1_i32 : i32 to index
    %c0_34 = arith.constant 0 : index
    %c0_35 = arith.constant 0 : index
    %83 = vector.load %arg11[%82, %c0_34, %c0_35] : memref<4x8x128xf32, #tpu.memory_space<vmem>>, vector<1x8x128xf32>
    %84 = vector.shape_cast %83 : vector<1x8x128xf32> to vector<8x128xf32>
    %85 = vector.shape_cast %81 : vector<8x128xf32> to vector<1x8x128xf32>
    tpu.vector_store %arg11[%82, %c0_34, %c0_35], %85 {strides = array<i32>} : memref<4x8x128xf32, #tpu.memory_space<vmem>>, vector<1x8x128xf32>,
    %c2_i32 = arith.constant 2 : i32
    %86 = arith.index_cast %c2_i32 : i32 to index
    %c0_36 = arith.constant 0 : index
    %c0_37 = arith.constant 0 : index
    %87 = vector.load %arg10[%86, %c0_36, %c0_37] : memref<4x8x512xf32, #tpu.memory_space<vmem>>, vector<1x8x512xf32>
    %88 = vector.shape_cast %87 : vector<1x8x512xf32> to vector<8x512xf32>
    %cst_38 = arith.constant dense<0.000000e+00> : vector<8x512xf32>
    %89 = tpu.matmul %81, %13, %cst_38 {dimension_numbers = #tpu.dot_dimension_numbers<[1], [0], [0], [1], [0, 0, 1, 1], [], []>} : vector<8x128xf32>, vector<128x512xf32>, vector<8x512xf32> -> vector<8x512xf32>
    %90 = arith.addf %88, %89 : vector<8x512xf32>
    %91 = vector.extract_strided_slice %90 {offsets = [0, 0], sizes = [8, 128], strides = [1, 1]} : vector<8x512xf32> to vector<8x128xf32>
    %92 = arith.negf %91 : vector<8x128xf32>
    %93 = math.exp %92 : vector<8x128xf32>
    %cst_39 = arith.constant 1.000000e+00 : f32
    %94 = vector.broadcast %cst_39 : f32 to vector<8x128xf32>
    %95 = arith.addf %94, %93 : vector<8x128xf32>
    %96 = arith.divf %94, %95 : vector<8x128xf32>
    %97 = vector.extract_strided_slice %90 {offsets = [0, 128], sizes = [8, 128], strides = [1, 1]} : vector<8x512xf32> to vector<8x128xf32>
    %98 = arith.negf %97 : vector<8x128xf32>
    %99 = math.exp %98 : vector<8x128xf32>
    %cst_40 = arith.constant 1.000000e+00 : f32
    %100 = vector.broadcast %cst_40 : f32 to vector<8x128xf32>
    %101 = arith.addf %100, %99 : vector<8x128xf32>
    %102 = arith.divf %100, %101 : vector<8x128xf32>
    %103 = vector.extract_strided_slice %90 {offsets = [0, 256], sizes = [8, 128], strides = [1, 1]} : vector<8x512xf32> to vector<8x128xf32>
    %104 = math.tanh %103 : vector<8x128xf32>
    %105 = vector.extract_strided_slice %90 {offsets = [0, 384], sizes = [8, 128], strides = [1, 1]} : vector<8x512xf32> to vector<8x128xf32>
    %106 = arith.negf %105 : vector<8x128xf32>
    %107 = math.exp %106 : vector<8x128xf32>
    %cst_41 = arith.constant 1.000000e+00 : f32
    %108 = vector.broadcast %cst_41 : f32 to vector<8x128xf32>
    %109 = arith.addf %108, %107 : vector<8x128xf32>
    %110 = arith.divf %108, %109 : vector<8x128xf32>
    %111 = arith.mulf %102, %79 : vector<8x128xf32>
    %112 = arith.mulf %96, %104 : vector<8x128xf32>
    %113 = arith.addf %111, %112 : vector<8x128xf32>
    %114 = math.tanh %113 : vector<8x128xf32>
    %115 = arith.mulf %110, %114 : vector<8x128xf32>
    %116 = arith.index_cast %c2_i32 : i32 to index
    %c0_42 = arith.constant 0 : index
    %c0_43 = arith.constant 0 : index
    %117 = vector.load %arg11[%116, %c0_42, %c0_43] : memref<4x8x128xf32, #tpu.memory_space<vmem>>, vector<1x8x128xf32>
    %118 = vector.shape_cast %117 : vector<1x8x128xf32> to vector<8x128xf32>
    %119 = vector.shape_cast %115 : vector<8x128xf32> to vector<1x8x128xf32>
    tpu.vector_store %arg11[%116, %c0_42, %c0_43], %119 {strides = array<i32>} : memref<4x8x128xf32, #tpu.memory_space<vmem>>, vector<1x8x128xf32>,
    %c3_i32 = arith.constant 3 : i32
    %120 = arith.index_cast %c3_i32 : i32 to index
    %c0_44 = arith.constant 0 : index
    %c0_45 = arith.constant 0 : index
    %121 = vector.load %arg10[%120, %c0_44, %c0_45] : memref<4x8x512xf32, #tpu.memory_space<vmem>>, vector<1x8x512xf32>
    %122 = vector.shape_cast %121 : vector<1x8x512xf32> to vector<8x512xf32>
    %cst_46 = arith.constant dense<0.000000e+00> : vector<8x512xf32>
    %123 = tpu.matmul %115, %13, %cst_46 {dimension_numbers = #tpu.dot_dimension_numbers<[1], [0], [0], [1], [0, 0, 1, 1], [], []>} : vector<8x128xf32>, vector<128x512xf32>, vector<8x512xf32> -> vector<8x512xf32>
    %124 = arith.addf %122, %123 : vector<8x512xf32>
    %125 = vector.extract_strided_slice %124 {offsets = [0, 0], sizes = [8, 128], strides = [1, 1]} : vector<8x512xf32> to vector<8x128xf32>
    %126 = arith.negf %125 : vector<8x128xf32>
    %127 = math.exp %126 : vector<8x128xf32>
    %cst_47 = arith.constant 1.000000e+00 : f32
    %128 = vector.broadcast %cst_47 : f32 to vector<8x128xf32>
    %129 = arith.addf %128, %127 : vector<8x128xf32>
    %130 = arith.divf %128, %129 : vector<8x128xf32>
    %131 = vector.extract_strided_slice %124 {offsets = [0, 128], sizes = [8, 128], strides = [1, 1]} : vector<8x512xf32> to vector<8x128xf32>
    %132 = arith.negf %131 : vector<8x128xf32>
    %133 = math.exp %132 : vector<8x128xf32>
    %cst_48 = arith.constant 1.000000e+00 : f32
    %134 = vector.broadcast %cst_48 : f32 to vector<8x128xf32>
    %135 = arith.addf %134, %133 : vector<8x128xf32>
    %136 = arith.divf %134, %135 : vector<8x128xf32>
    %137 = vector.extract_strided_slice %124 {offsets = [0, 256], sizes = [8, 128], strides = [1, 1]} : vector<8x512xf32> to vector<8x128xf32>
    %138 = math.tanh %137 : vector<8x128xf32>
    %139 = vector.extract_strided_slice %124 {offsets = [0, 384], sizes = [8, 128], strides = [1, 1]} : vector<8x512xf32> to vector<8x128xf32>
    %140 = arith.negf %139 : vector<8x128xf32>
    %141 = math.exp %140 : vector<8x128xf32>
    %cst_49 = arith.constant 1.000000e+00 : f32
    %142 = vector.broadcast %cst_49 : f32 to vector<8x128xf32>
    %143 = arith.addf %142, %141 : vector<8x128xf32>
    %144 = arith.divf %142, %143 : vector<8x128xf32>
    %145 = arith.mulf %136, %113 : vector<8x128xf32>
    %146 = arith.mulf %130, %138 : vector<8x128xf32>
    %147 = arith.addf %145, %146 : vector<8x128xf32>
    %148 = math.tanh %147 : vector<8x128xf32>
    %149 = arith.mulf %144, %148 : vector<8x128xf32>
    %150 = arith.index_cast %c3_i32 : i32 to index
    %c0_50 = arith.constant 0 : index
    %c0_51 = arith.constant 0 : index
    %151 = vector.load %arg11[%150, %c0_50, %c0_51] : memref<4x8x128xf32, #tpu.memory_space<vmem>>, vector<1x8x128xf32>
    %152 = vector.shape_cast %151 : vector<1x8x128xf32> to vector<8x128xf32>
    %153 = vector.shape_cast %149 : vector<8x128xf32> to vector<1x8x128xf32>
    tpu.vector_store %arg11[%150, %c0_50, %c0_51], %153 {strides = array<i32>} : memref<4x8x128xf32, #tpu.memory_space<vmem>>, vector<1x8x128xf32>,
    %c4_i32 = arith.constant 4 : i32
    %c0_52 = arith.constant 0 : index
    %c0_53 = arith.constant 0 : index
    %c0_54 = arith.constant 0 : index
    %154 = vector.load %arg12[%c0_52, %c0_53, %c0_54] : memref<2x8x128xf32, #tpu.memory_space<vmem>>, vector<1x8x128xf32>
    %155 = vector.shape_cast %154 : vector<1x8x128xf32> to vector<8x128xf32>
    %156 = vector.shape_cast %149 : vector<8x128xf32> to vector<1x8x128xf32>
    tpu.vector_store %arg12[%c0_52, %c0_53, %c0_54], %156 {strides = array<i32>} : memref<2x8x128xf32, #tpu.memory_space<vmem>>, vector<1x8x128xf32>,
    %c0_55 = arith.constant 0 : index
    %c0_56 = arith.constant 0 : index
    %c0_57 = arith.constant 0 : index
    %157 = vector.load %arg13[%c0_55, %c0_56, %c0_57] : memref<2x8x128xf32, #tpu.memory_space<vmem>>, vector<1x8x128xf32>
    %158 = vector.shape_cast %157 : vector<1x8x128xf32> to vector<8x128xf32>
    %159 = vector.shape_cast %147 : vector<8x128xf32> to vector<1x8x128xf32>
    tpu.vector_store %arg13[%c0_55, %c0_56, %c0_57], %159 {strides = array<i32>} : memref<2x8x128xf32, #tpu.memory_space<vmem>>, vector<1x8x128xf32>,
    %c0_58 = arith.constant 0 : index
    %c0_59 = arith.constant 0 : index
    %c0_60 = arith.constant 0 : index
    %160 = vector.load %arg11[%c0_58, %c0_59, %c0_60] : memref<4x8x128xf32, #tpu.memory_space<vmem>>, vector<4x8x128xf32>
    %161 = vector.shape_cast %160 : vector<4x8x128xf32> to vector<32x128xf32>
    %c0_61 = arith.constant 0 : index
    %c0_62 = arith.constant 0 : index
    %c0_63 = arith.constant 0 : index
    %162 = vector.load %arg4[%c0_61, %c0_62, %c0_63] : memref<1x128x512xf32, #tpu.memory_space<vmem>>, vector<1x128x512xf32>
    %163 = vector.shape_cast %162 : vector<1x128x512xf32> to vector<128x512xf32>
    %cst_64 = arith.constant dense<0.000000e+00> : vector<32x512xf32>
    %164 = tpu.matmul %161, %163, %cst_64 {dimension_numbers = #tpu.dot_dimension_numbers<[1], [0], [0], [1], [0, 0, 1, 1], [], []>} : vector<32x128xf32>, vector<128x512xf32>, vector<32x512xf32> -> vector<32x512xf32>
    %c0_65 = arith.constant 0 : index
    %c0_66 = arith.constant 0 : index
    %c0_67 = arith.constant 0 : index
    %165 = vector.load %arg5[%c0_65, %c0_66, %c0_67] : memref<1x1x512xf32, #tpu.memory_space<vmem>>, vector<1x1x512xf32>
    %166 = vector.shape_cast %165 : vector<1x1x512xf32> to vector<1x512xf32>
    %167 = vector.broadcast %166 : vector<1x512xf32> to vector<32x512xf32>
    %168 = arith.addf %164, %167 : vector<32x512xf32>
    %169 = vector.shape_cast %168 : vector<32x512xf32> to vector<4x8x512xf32>
    %c0_68 = arith.constant 0 : index
    %c0_69 = arith.constant 0 : index
    %c0_70 = arith.constant 0 : index
    %170 = vector.load %arg10[%c0_68, %c0_69, %c0_70] : memref<4x8x512xf32, #tpu.memory_space<vmem>>, vector<4x8x512xf32>
    tpu.vector_store %arg10[%c0_68, %c0_69, %c0_70], %169 {strides = array<i32>} : memref<4x8x512xf32, #tpu.memory_space<vmem>>, vector<4x8x512xf32>,
    %c1 = arith.constant 1 : index
    %c0_71 = arith.constant 0 : index
    %c0_72 = arith.constant 0 : index
    %171 = vector.load %arg6[%c1, %c0_71, %c0_72] : memref<2x128x512xf32, #tpu.memory_space<vmem>>, vector<1x128x512xf32>
    %172 = vector.shape_cast %171 : vector<1x128x512xf32> to vector<128x512xf32>
    %c1_73 = arith.constant 1 : index
    %c0_74 = arith.constant 0 : index
    %c0_75 = arith.constant 0 : index
    %173 = vector.load %arg12[%c1_73, %c0_74, %c0_75] : memref<2x8x128xf32, #tpu.memory_space<vmem>>, vector<1x8x128xf32>
    %174 = vector.shape_cast %173 : vector<1x8x128xf32> to vector<8x128xf32>
    %c1_76 = arith.constant 1 : index
    %c0_77 = arith.constant 0 : index
    %c0_78 = arith.constant 0 : index
    %175 = vector.load %arg13[%c1_76, %c0_77, %c0_78] : memref<2x8x128xf32, #tpu.memory_space<vmem>>, vector<1x8x128xf32>
    %176 = vector.shape_cast %175 : vector<1x8x128xf32> to vector<8x128xf32>
    %c0_i32_79 = arith.constant 0 : i32
    %177 = arith.index_cast %c0_i32_79 : i32 to index
    %c0_80 = arith.constant 0 : index
    %c0_81 = arith.constant 0 : index
    %178 = vector.load %arg10[%177, %c0_80, %c0_81] : memref<4x8x512xf32, #tpu.memory_space<vmem>>, vector<1x8x512xf32>
    %179 = vector.shape_cast %178 : vector<1x8x512xf32> to vector<8x512xf32>
    %cst_82 = arith.constant dense<0.000000e+00> : vector<8x512xf32>
    %180 = tpu.matmul %174, %172, %cst_82 {dimension_numbers = #tpu.dot_dimension_numbers<[1], [0], [0], [1], [0, 0, 1, 1], [], []>} : vector<8x128xf32>, vector<128x512xf32>, vector<8x512xf32> -> vector<8x512xf32>
    %181 = arith.addf %179, %180 : vector<8x512xf32>
    %182 = vector.extract_strided_slice %181 {offsets = [0, 0], sizes = [8, 128], strides = [1, 1]} : vector<8x512xf32> to vector<8x128xf32>
    %183 = arith.negf %182 : vector<8x128xf32>
    %184 = math.exp %183 : vector<8x128xf32>
    %cst_83 = arith.constant 1.000000e+00 : f32
    %185 = vector.broadcast %cst_83 : f32 to vector<8x128xf32>
    %186 = arith.addf %185, %184 : vector<8x128xf32>
    %187 = arith.divf %185, %186 : vector<8x128xf32>
    %188 = vector.extract_strided_slice %181 {offsets = [0, 128], sizes = [8, 128], strides = [1, 1]} : vector<8x512xf32> to vector<8x128xf32>
    %189 = arith.negf %188 : vector<8x128xf32>
    %190 = math.exp %189 : vector<8x128xf32>
    %cst_84 = arith.constant 1.000000e+00 : f32
    %191 = vector.broadcast %cst_84 : f32 to vector<8x128xf32>
    %192 = arith.addf %191, %190 : vector<8x128xf32>
    %193 = arith.divf %191, %192 : vector<8x128xf32>
    %194 = vector.extract_strided_slice %181 {offsets = [0, 256], sizes = [8, 128], strides = [1, 1]} : vector<8x512xf32> to vector<8x128xf32>
    %195 = math.tanh %194 : vector<8x128xf32>
    %196 = vector.extract_strided_slice %181 {offsets = [0, 384], sizes = [8, 128], strides = [1, 1]} : vector<8x512xf32> to vector<8x128xf32>
    %197 = arith.negf %196 : vector<8x128xf32>
    %198 = math.exp %197 : vector<8x128xf32>
    %cst_85 = arith.constant 1.000000e+00 : f32
    %199 = vector.broadcast %cst_85 : f32 to vector<8x128xf32>
    %200 = arith.addf %199, %198 : vector<8x128xf32>
    %201 = arith.divf %199, %200 : vector<8x128xf32>
    %202 = arith.mulf %193, %176 : vector<8x128xf32>
    %203 = arith.mulf %187, %195 : vector<8x128xf32>
    %204 = arith.addf %202, %203 : vector<8x128xf32>
    %205 = math.tanh %204 : vector<8x128xf32>
    %206 = arith.mulf %201, %205 : vector<8x128xf32>
    %c1_i32_86 = arith.constant 1 : i32
    %207 = arith.index_cast %c1_i32_86 : i32 to index
    %c0_87 = arith.constant 0 : index
    %c0_88 = arith.constant 0 : index
    %208 = vector.load %arg10[%207, %c0_87, %c0_88] : memref<4x8x512xf32, #tpu.memory_space<vmem>>, vector<1x8x512xf32>
    %209 = vector.shape_cast %208 : vector<1x8x512xf32> to vector<8x512xf32>
    %cst_89 = arith.constant dense<0.000000e+00> : vector<8x512xf32>
    %210 = tpu.matmul %206, %172, %cst_89 {dimension_numbers = #tpu.dot_dimension_numbers<[1], [0], [0], [1], [0, 0, 1, 1], [], []>} : vector<8x128xf32>, vector<128x512xf32>, vector<8x512xf32> -> vector<8x512xf32>
    %211 = arith.addf %209, %210 : vector<8x512xf32>
    %212 = vector.extract_strided_slice %211 {offsets = [0, 0], sizes = [8, 128], strides = [1, 1]} : vector<8x512xf32> to vector<8x128xf32>
    %213 = arith.negf %212 : vector<8x128xf32>
    %214 = math.exp %213 : vector<8x128xf32>
    %cst_90 = arith.constant 1.000000e+00 : f32
    %215 = vector.broadcast %cst_90 : f32 to vector<8x128xf32>
    %216 = arith.addf %215, %214 : vector<8x128xf32>
    %217 = arith.divf %215, %216 : vector<8x128xf32>
    %218 = vector.extract_strided_slice %211 {offsets = [0, 128], sizes = [8, 128], strides = [1, 1]} : vector<8x512xf32> to vector<8x128xf32>
    %219 = arith.negf %218 : vector<8x128xf32>
    %220 = math.exp %219 : vector<8x128xf32>
    %cst_91 = arith.constant 1.000000e+00 : f32
    %221 = vector.broadcast %cst_91 : f32 to vector<8x128xf32>
    %222 = arith.addf %221, %220 : vector<8x128xf32>
    %223 = arith.divf %221, %222 : vector<8x128xf32>
    %224 = vector.extract_strided_slice %211 {offsets = [0, 256], sizes = [8, 128], strides = [1, 1]} : vector<8x512xf32> to vector<8x128xf32>
    %225 = math.tanh %224 : vector<8x128xf32>
    %226 = vector.extract_strided_slice %211 {offsets = [0, 384], sizes = [8, 128], strides = [1, 1]} : vector<8x512xf32> to vector<8x128xf32>
    %227 = arith.negf %226 : vector<8x128xf32>
    %228 = math.exp %227 : vector<8x128xf32>
    %cst_92 = arith.constant 1.000000e+00 : f32
    %229 = vector.broadcast %cst_92 : f32 to vector<8x128xf32>
    %230 = arith.addf %229, %228 : vector<8x128xf32>
    %231 = arith.divf %229, %230 : vector<8x128xf32>
    %232 = arith.mulf %223, %204 : vector<8x128xf32>
    %233 = arith.mulf %217, %225 : vector<8x128xf32>
    %234 = arith.addf %232, %233 : vector<8x128xf32>
    %235 = math.tanh %234 : vector<8x128xf32>
    %236 = arith.mulf %231, %235 : vector<8x128xf32>
    %c2_i32_93 = arith.constant 2 : i32
    %237 = arith.index_cast %c2_i32_93 : i32 to index
    %c0_94 = arith.constant 0 : index
    %c0_95 = arith.constant 0 : index
    %238 = vector.load %arg10[%237, %c0_94, %c0_95] : memref<4x8x512xf32, #tpu.memory_space<vmem>>, vector<1x8x512xf32>
    %239 = vector.shape_cast %238 : vector<1x8x512xf32> to vector<8x512xf32>
    %cst_96 = arith.constant dense<0.000000e+00> : vector<8x512xf32>
    %240 = tpu.matmul %236, %172, %cst_96 {dimension_numbers = #tpu.dot_dimension_numbers<[1], [0], [0], [1], [0, 0, 1, 1], [], []>} : vector<8x128xf32>, vector<128x512xf32>, vector<8x512xf32> -> vector<8x512xf32>
    %241 = arith.addf %239, %240 : vector<8x512xf32>
    %242 = vector.extract_strided_slice %241 {offsets = [0, 0], sizes = [8, 128], strides = [1, 1]} : vector<8x512xf32> to vector<8x128xf32>
    %243 = arith.negf %242 : vector<8x128xf32>
    %244 = math.exp %243 : vector<8x128xf32>
    %cst_97 = arith.constant 1.000000e+00 : f32
    %245 = vector.broadcast %cst_97 : f32 to vector<8x128xf32>
    %246 = arith.addf %245, %244 : vector<8x128xf32>
    %247 = arith.divf %245, %246 : vector<8x128xf32>
    %248 = vector.extract_strided_slice %241 {offsets = [0, 128], sizes = [8, 128], strides = [1, 1]} : vector<8x512xf32> to vector<8x128xf32>
    %249 = arith.negf %248 : vector<8x128xf32>
    %250 = math.exp %249 : vector<8x128xf32>
    %cst_98 = arith.constant 1.000000e+00 : f32
    %251 = vector.broadcast %cst_98 : f32 to vector<8x128xf32>
    %252 = arith.addf %251, %250 : vector<8x128xf32>
    %253 = arith.divf %251, %252 : vector<8x128xf32>
    %254 = vector.extract_strided_slice %241 {offsets = [0, 256], sizes = [8, 128], strides = [1, 1]} : vector<8x512xf32> to vector<8x128xf32>
    %255 = math.tanh %254 : vector<8x128xf32>
    %256 = vector.extract_strided_slice %241 {offsets = [0, 384], sizes = [8, 128], strides = [1, 1]} : vector<8x512xf32> to vector<8x128xf32>
    %257 = arith.negf %256 : vector<8x128xf32>
    %258 = math.exp %257 : vector<8x128xf32>
    %cst_99 = arith.constant 1.000000e+00 : f32
    %259 = vector.broadcast %cst_99 : f32 to vector<8x128xf32>
    %260 = arith.addf %259, %258 : vector<8x128xf32>
    %261 = arith.divf %259, %260 : vector<8x128xf32>
    %262 = arith.mulf %253, %234 : vector<8x128xf32>
    %263 = arith.mulf %247, %255 : vector<8x128xf32>
    %264 = arith.addf %262, %263 : vector<8x128xf32>
    %265 = math.tanh %264 : vector<8x128xf32>
    %266 = arith.mulf %261, %265 : vector<8x128xf32>
    %c3_i32_100 = arith.constant 3 : i32
    %267 = arith.index_cast %c3_i32_100 : i32 to index
    %c0_101 = arith.constant 0 : index
    %c0_102 = arith.constant 0 : index
    %268 = vector.load %arg10[%267, %c0_101, %c0_102] : memref<4x8x512xf32, #tpu.memory_space<vmem>>, vector<1x8x512xf32>
    %269 = vector.shape_cast %268 : vector<1x8x512xf32> to vector<8x512xf32>
    %cst_103 = arith.constant dense<0.000000e+00> : vector<8x512xf32>
    %270 = tpu.matmul %266, %172, %cst_103 {dimension_numbers = #tpu.dot_dimension_numbers<[1], [0], [0], [1], [0, 0, 1, 1], [], []>} : vector<8x128xf32>, vector<128x512xf32>, vector<8x512xf32> -> vector<8x512xf32>
    %271 = arith.addf %269, %270 : vector<8x512xf32>
    %272 = vector.extract_strided_slice %271 {offsets = [0, 0], sizes = [8, 128], strides = [1, 1]} : vector<8x512xf32> to vector<8x128xf32>
    %273 = arith.negf %272 : vector<8x128xf32>
    %274 = math.exp %273 : vector<8x128xf32>
    %cst_104 = arith.constant 1.000000e+00 : f32
    %275 = vector.broadcast %cst_104 : f32 to vector<8x128xf32>
    %276 = arith.addf %275, %274 : vector<8x128xf32>
    %277 = arith.divf %275, %276 : vector<8x128xf32>
    %278 = vector.extract_strided_slice %271 {offsets = [0, 128], sizes = [8, 128], strides = [1, 1]} : vector<8x512xf32> to vector<8x128xf32>
    %279 = arith.negf %278 : vector<8x128xf32>
    %280 = math.exp %279 : vector<8x128xf32>
    %cst_105 = arith.constant 1.000000e+00 : f32
    %281 = vector.broadcast %cst_105 : f32 to vector<8x128xf32>
    %282 = arith.addf %281, %280 : vector<8x128xf32>
    %283 = arith.divf %281, %282 : vector<8x128xf32>
    %284 = vector.extract_strided_slice %271 {offsets = [0, 256], sizes = [8, 128], strides = [1, 1]} : vector<8x512xf32> to vector<8x128xf32>
    %285 = math.tanh %284 : vector<8x128xf32>
    %286 = vector.extract_strided_slice %271 {offsets = [0, 384], sizes = [8, 128], strides = [1, 1]} : vector<8x512xf32> to vector<8x128xf32>
    %287 = arith.negf %286 : vector<8x128xf32>
    %288 = math.exp %287 : vector<8x128xf32>
    %cst_106 = arith.constant 1.000000e+00 : f32
    %289 = vector.broadcast %cst_106 : f32 to vector<8x128xf32>
    %290 = arith.addf %289, %288 : vector<8x128xf32>
    %291 = arith.divf %289, %290 : vector<8x128xf32>
    %292 = arith.mulf %283, %264 : vector<8x128xf32>
    %293 = arith.mulf %277, %285 : vector<8x128xf32>
    %294 = arith.addf %292, %293 : vector<8x128xf32>
    %295 = math.tanh %294 : vector<8x128xf32>
    %296 = arith.mulf %291, %295 : vector<8x128xf32>
    %c4_i32_107 = arith.constant 4 : i32
    %c1_108 = arith.constant 1 : index
    %c0_109 = arith.constant 0 : index
    %c0_110 = arith.constant 0 : index
    %297 = vector.load %arg12[%c1_108, %c0_109, %c0_110] : memref<2x8x128xf32, #tpu.memory_space<vmem>>, vector<1x8x128xf32>
    %298 = vector.shape_cast %297 : vector<1x8x128xf32> to vector<8x128xf32>
    %299 = vector.shape_cast %296 : vector<8x128xf32> to vector<1x8x128xf32>
    tpu.vector_store %arg12[%c1_108, %c0_109, %c0_110], %299 {strides = array<i32>} : memref<2x8x128xf32, #tpu.memory_space<vmem>>, vector<1x8x128xf32>,
    %c1_111 = arith.constant 1 : index
    %c0_112 = arith.constant 0 : index
    %c0_113 = arith.constant 0 : index
    %300 = vector.load %arg13[%c1_111, %c0_112, %c0_113] : memref<2x8x128xf32, #tpu.memory_space<vmem>>, vector<1x8x128xf32>
    %301 = vector.shape_cast %300 : vector<1x8x128xf32> to vector<8x128xf32>
    %302 = vector.shape_cast %294 : vector<8x128xf32> to vector<1x8x128xf32>
    tpu.vector_store %arg13[%c1_111, %c0_112, %c0_113], %302 {strides = array<i32>} : memref<2x8x128xf32, #tpu.memory_space<vmem>>, vector<1x8x128xf32>,
    %c1_i32_114 = arith.constant 1 : i32
    %303 = arith.cmpi eq, %arg0, %c1_i32_114 : i32
    %304 = arith.extui %303 : i1 to i32
    %c0_i32_115 = arith.constant 0 : i32
    %305 = arith.cmpi ne, %304, %c0_i32_115 : i32
    scf.if %305 {
      %c0_116 = arith.constant 0 : index
      %c0_117 = arith.constant 0 : index
      %306 = vector.load %arg7[%c0_116, %c0_117] : memref<128x1xf32, #tpu.memory_space<vmem>>, vector<128x1xf32>
      %cst_118 = arith.constant dense<0.000000e+00> : vector<8x1xf32>
      %307 = tpu.matmul %296, %306, %cst_118 {dimension_numbers = #tpu.dot_dimension_numbers<[1], [0], [0], [1], [0, 0, 1, 1], [], []>} : vector<8x128xf32>, vector<128x1xf32>, vector<8x1xf32> -> vector<8x1xf32>
      %c0_119 = arith.constant 0 : index
      %c0_120 = arith.constant 0 : index
      %308 = vector.load %arg8[%c0_119, %c0_120] : memref<1x1xf32, #tpu.memory_space<vmem>>, vector<1x1xf32>
      %309 = vector.broadcast %308 : vector<1x1xf32> to vector<8x1xf32>
      %310 = arith.addf %307, %309 : vector<8x1xf32>
      %c0_121 = arith.constant 0 : index
      %c0_122 = arith.constant 0 : index
      %311 = vector.load %arg9[%c0_121, %c0_122] : memref<8x1xf32, #tpu.memory_space<vmem>>, vector<8x1xf32>
      tpu.vector_store %arg9[%c0_121, %c0_122], %310 {strides = array<i32>} : memref<8x1xf32, #tpu.memory_space<vmem>>, vector<8x1xf32>,
    } else {
    }
    return
  }
  func.func @transform_0(%arg0: i32) -> (i32, i32, i32) {
    %c0_i32 = arith.constant 0 : i32
    %c0_i32_0 = arith.constant 0 : i32
    %c0_i32_1 = arith.constant 0 : i32
    return %arg0, %c0_i32, %c0_i32_0 : i32, i32, i32
  }
  func.func @transform_1(%arg0: i32) -> (i32, i32) {
    %c0_i32 = arith.constant 0 : i32
    %c0_i32_0 = arith.constant 0 : i32
    %c0_i32_1 = arith.constant 0 : i32
    return %c0_i32, %c0_i32_0 : i32, i32
  }
  func.func @transform_2(%arg0: i32) -> (i32, i32) {
    %c0_i32 = arith.constant 0 : i32
    %c0_i32_0 = arith.constant 0 : i32
    %c0_i32_1 = arith.constant 0 : i32
    return %c0_i32, %c0_i32_0 : i32, i32
  }
  func.func @transform_3(%arg0: i32) -> (i32, i32, i32) {
    %c0_i32 = arith.constant 0 : i32
    %c0_i32_0 = arith.constant 0 : i32
    %c0_i32_1 = arith.constant 0 : i32
    %c0_i32_2 = arith.constant 0 : i32
    return %c0_i32, %c0_i32_0, %c0_i32_1 : i32, i32, i32
  }
  func.func @transform_4(%arg0: i32) -> (i32, i32, i32) {
    %c0_i32 = arith.constant 0 : i32
    %c0_i32_0 = arith.constant 0 : i32
    %c0_i32_1 = arith.constant 0 : i32
    %c0_i32_2 = arith.constant 0 : i32
    return %c0_i32, %c0_i32_0, %c0_i32_1 : i32, i32, i32
  }
  func.func @transform_5(%arg0: i32) -> (i32, i32, i32) {
    %c0_i32 = arith.constant 0 : i32
    %c0_i32_0 = arith.constant 0 : i32
    %c0_i32_1 = arith.constant 0 : i32
    %c0_i32_2 = arith.constant 0 : i32
    return %c0_i32, %c0_i32_0, %c0_i32_1 : i32, i32, i32
  }
  func.func @transform_6(%arg0: i32) -> (i32, i32) {
    %c0_i32 = arith.constant 0 : i32
    %c0_i32_0 = arith.constant 0 : i32
    %c0_i32_1 = arith.constant 0 : i32
    return %c0_i32, %c0_i32_0 : i32, i32
  }
  func.func @transform_7(%arg0: i32) -> (i32, i32) {
    %c0_i32 = arith.constant 0 : i32
    %c0_i32_0 = arith.constant 0 : i32
    %c0_i32_1 = arith.constant 0 : i32
    return %c0_i32, %c0_i32_0 : i32, i32
  }
  func.func @transform_8(%arg0: i32) -> (i32, i32) {
    %c0_i32 = arith.constant 0 : i32
    %c0_i32_0 = arith.constant 0 : i32
    %c0_i32_1 = arith.constant 0 : i32
    return %c0_i32, %c0_i32_0 : i32, i32
  }
}

</mosaic_0001>

<bundles_post_ra>
// kernel: lstm_forward.1
= control target key start
LH: loop header
LB: loop body
LE: loop exit
PB: predicated region body
PF: predicated region fallthrough
CT: control target
= control target key end

     0   :  { %s4042_s0 = inlined_call_operand.vmem [shape: f32[8,8,4], index: 0, kind: input, shape index: {}]   ;;  %s4043_s1 = inlined_call_operand.vmem [shape: f32[4,512], index: 1, kind: input, shape index: {}]   ;;  %s4044_s2 = inlined_call_operand.vmem [shape: f32[1,512], index: 2, kind: input, shape index: {}]   ;;  %s4045_s3 = inlined_call_operand.hbm [shape: f32[1,128,512], index: 3, kind: input, shape index: {}]   ;;  %s4046_s4 = inlined_call_operand.vmem [shape: f32[1,1,512], index: 4, kind: input, shape index: {}]   ;;  %s4047_s5 = inlined_call_operand.hbm [shape: f32[2,128,512], index: 5, kind: input, shape index: {}]   ;;  %s4048_s6 = inlined_call_operand.vmem [shape: f32[128,1], index: 6, kind: input, shape index: {}]   ;;  %s4049_s7 = inlined_call_operand.<no memory space> [shape: f32[1,1], index: 7, kind: input, shape index: {}]   ;;  %s4050_s8 = inlined_call_operand.vmem [shape: f32[8,1], index: 8, kind: output, shape index: {}]  }
   0x1   :  { %v13_v0 = vstv %s4049_s7 }
   0x2   :  { %14 = vst [vmem:[#allocation6] sm:$0x1] %v13_v0 }
   0x3   :  { %15 = vsyncpa [#allocation8], 0 }
   0x4   :  { %16 = vsyncpa [#allocation10], 0  ;;  %s2947_s29 = smov 0  }
   0x5 LB: > { %s2953_s30 = sadd.s32 4294967295, %s2889_s29   ;;  %p2556_p0 = scmp.ge.s32.totalorder %s2889_s29, 1  ;;  %s2889_s29 = sphi %s2947_s29, %s22_s29  }
   0x6   : > { %p221_p1 = scmp.lt.s32.totalorder %s2889_s29, 3  ;;  %s2891_s7 = smov [#allocation7]  }
   0x7   : > { %s239_s9 = sshll.u32 %s2891_s7, 4  ;;  %p2673_p4 = scmp.eq.s32.totalorder %s2953_s30, 0  ;;  %s240_s9 = int_to_ptr.vmem [resolvable:$true] %s239_s9 }
   0x8   : > { %p2958_p3 = pnand %p2556_p0, %p221_p1  ;;  %s2892_s11 = smov [#allocation9]  }
   0x9   : > { %s255_s12 = sshll.u32 %s2892_s11, 4  ;;  %s2834_s14 = scalar_lea.vmem %s240_s9, 8192  ;;  %s256_s12 = int_to_ptr.vmem [resolvable:$true] %s255_s12 }
   0xa   : > { %p2666_p5 = pneg %p2958_p3  ;;  %p2835_p8 = scmp.ne.s32.totalorder %s240_s9, %s2834_s14 }
   0xb   : > { %p2842_p11 = scmp.lt.s32.totalorder %s240_s9, %s240_s9  ;;  %p2843_p12 = scmp.lt.s32.totalorder %s2834_s14, %s2834_s14 }
   0xc   : > { %p2967_p6 = pnand %p2673_p4, %p2666_p5 }
   0xd   : > { %p2844_p13 = por %p2843_p12, %p2842_p11 }
   0xe   : > { %p2825_p7 = pneg %p2967_p6 }
  0x10   : > { %p2837_p9 = pnand %p2835_p8, %p2825_p7 }
  0x12   : > { %p2838_p10 = pneg %p2837_p9 }
  0x14   : > { %p2845_p0 = pnand %p2844_p13, %p2838_p10 }
  0x16   : > { %2848 = shalt.err (!%p2845_p0)
}
  0x17   : > { %s2893_s15 = smov 512   ;;  %s2894_s16 = smov 32  }
  0x18   : > { %2669 = dma.hbm_to_vmem [thread:$0]  (!%p2967_p6), %s4045_s3, 8192, %s240_s9, [#allocation8], %s2893_s15, %s2893_s15, %s2894_s16  }
  0x19   : > { %s2860_s19 = scalar_lea.vmem %s256_s12, 16384  ;;  %p2868_p9 = scmp.lt.s32.totalorder %s256_s12, %s256_s12 }
  0x1a   : > { %p2861_p1 = scmp.ne.s32.totalorder %s256_s12, %s2860_s19  ;;  %p2869_p2 = scmp.lt.s32.totalorder %s2860_s19, %s2860_s19 }
  0x1c   : > { %p2863_p5 = pnand %p2861_p1, %p2825_p7  ;;  %p2870_p11 = por %p2869_p2, %p2868_p9 }
  0x1e   : > { %p2864_p8 = pneg %p2863_p5 }
  0x20   : > { %p2871_p10 = pnand %p2870_p11, %p2864_p8 }
  0x22   : > { %2874 = shalt.err (!%p2871_p10)
}
  0x23   : > { %2672 = dma.hbm_to_vmem [thread:$0]  (!%p2967_p6), %s4047_s5, 16384, %s256_s12, [#allocation10], %s2893_s15, %s2893_s15, %s2894_s16  }
  0x24   : > { %286 = sbr.rel (%p2958_p3) target bundleno = 2325 (0x915), region = 52 }
  0x29   : > { %2880 = dma.done.wait (%p2673_p4), [#allocation8], 8192  }
  0x2a   : > { %2882 = vsyncadd (%p2673_p4), [#allocation8], 4294959104 }
  0x2b   : > { %2884 = dma.done.wait (%p2673_p4), [#allocation10], 16384  }
  0x2c   : > { %2886 = vsyncadd (%p2673_p4), [#allocation10], 4294950912  ;;  %s2563_s22 = sshll.u32 %s2953_s30, 2  ;;  %p4166_p3 = scmp.ne.s32.totalorder %s2953_s30, 0 }
  0x2d   : > { %p320_p2 = scmp.lt.s32.totalorder %s2563_s22, 7 }
  0x2e   : > { %328 = sbr.rel (%p4166_p3) target bundleno = 54 (0x36), region = 64 }
  0x2f   : > { %s4391_s22 = smov (!%p320_p2, %s2563_s22), 7 }
  0x30   : > { %s2564_s23 = sshll.u32 %s4391_s22, 3 }
  0x31   : > { %s3003_s26 = scalar_lea.vmem %s4042_s0, %s2564_s23 }
  0x33   : > { %v2895_v1 = vmov 0.0  }
  0x34   : > { %329 = vst [vmem:[#allocation4] sm:$0xff] %v2895_v1  ;;  %330 = vst [vmem:[#allocation4 + $0x8] sm:$0xff] %v2895_v1 }
  0x35   : > { %331 = vst [vmem:[#allocation5 + $0x8] sm:$0xff] %v2895_v1  ;;  %332 = vst [vmem:[#allocation5] sm:$0xff] %v2895_v1 }
  0x36 PF: > { %v337_v2 = vld [vmem:[%s4043_s1] sm:$0xff]  ;;  %vm378_vm0 = vcmask 1043456   ;;  %v338_v3 = vld [vmem:[%s4043_s1 + $0x8] sm:$0xff]  ;;  %v4053_v6 = vmov 0.0   ;;  %vm365_vm1 = vcmask 31744   ;;  %v3022_v11 = vld [vmem:[#allocation9 + $0x1f0] sm:$0xff] }
  0x37   : > { %v363_v4 = vcombine.high %v337_v2, %v337_v2  ;;  %v364_v5 = vcombine.high %v338_v3, %v338_v3  ;;  %451 = vmatprep.mubr.f32.mxu0 %v4053_v6  ;;  %540 = vmatprep.mubr.f32.mxu1 %v4053_v6  ;;  %v333_v7 = vld [vmem:[%s3003_s26] sm:$0xff]  ;;  %v3016_v8 = vld [vmem:[#allocation9 + $0x1e8] sm:$0xff]  ;;  %v3034_v15 = vld [vmem:[#allocation9 + $0x1d0] sm:$0xff]  ;;  %p2602_p4 = scmp.ne.s32.totalorder %s2953_s30, 1 }
  0x38   : > { %4167 = vst [vmem:[#allocation13_spill] sm:$0xff] %v3016_v8  ;;  %v3018_v9 = vld [vmem:[#allocation9 + $0x1f8] sm:$0xff]  ;;  %v3020_v10 = vld [vmem:[#allocation9 + $0x1e0] sm:$0xff]  ;;  %v3026_v12 = vld [vmem:[#allocation9 + $0x1c8] sm:$0xff] }
  0x39   : > { %2566 = vmatprep.subr.msk.mxu0 %vm378_vm0, %v363_v4  ;;  %2572 = vmatprep.subr.msk.mxu1 %vm378_vm0, %v364_v5  ;;  %4168 = vst [vmem:[#allocation14_spill] sm:$0xff] %v3018_v9  ;;  %v3028_v13 = vld [vmem:[#allocation9 + $0x1d8] sm:$0xff]  ;;  %v3032_v14 = vld [vmem:[#allocation9 + $0x1c0] sm:$0xff]  ;;  %v3038_v16 = vld [vmem:[#allocation9 + $0x1a8] sm:$0xff] }
  0x3a   : > { %2567 = vmatpush1.msk.msra.mxu0 %vm378_vm0, %v337_v2  ;;  %2573 = vmatpush1.msk.msra.mxu1 %vm378_vm0, %v338_v3  ;;  %v3040_v17 = vld [vmem:[#allocation9 + $0x1b8] sm:$0xff]  ;;  %v3044_v18 = vld [vmem:[#allocation9 + $0x1a0] sm:$0xff]  ;;  %v3046_v19 = vld [vmem:[#allocation9 + $0x1b0] sm:$0xff] }
  0x3b   : > { %2568 = vmatmul.mubr.msk.f32.vlgmr.msra.gmra.mxu0 %vm365_vm1, %v333_v7  ;;  %651 = vmatprep.subr.mxu0 %v3016_v8  ;;  %v3050_v20 = vld [vmem:[#allocation9 + $0x188] sm:$0xff]  ;;  %v3052_v21 = vld [vmem:[#allocation9 + $0x198] sm:$0xff]  ;;  %v3056_v22 = vld [vmem:[#allocation9 + $0x180] sm:$0xff] }
  0x3c   : > { %722 = vmatprep.subr.mxu1 %v3018_v9  ;;  %2574 = vmatmul.mubr.msk.f32.vlgmr.msra.gmra.mxu1 %vm365_vm1, %v333_v7  ;;  %v3058_v23 = vld [vmem:[#allocation9 + $0x190] sm:$0xff]  ;;  %v3062_v24 = vld [vmem:[#allocation9 + $0x168] sm:$0xff]  ;;  %v3064_v25 = vld [vmem:[#allocation9 + $0x178] sm:$0xff] }
  0x3d   : > { %652 = vmatpush1.msra.mxu0 %v3020_v10  ;;  %723 = vmatpush1.msra.mxu1 %v3022_v11  ;;  %v3068_v26 = vld [vmem:[#allocation9 + $0x160] sm:$0xff]  ;;  %v3070_v27 = vld [vmem:[#allocation9 + $0x170] sm:$0xff]  ;;  %v3074_v28 = vld [vmem:[#allocation9 + $0x148] sm:$0xff] }
  0x3e   : > { %653 = vmatprep.subr.mxu0 %v3026_v12  ;;  %724 = vmatprep.subr.mxu1 %v3028_v13  ;;  %v3076_v29 = vld [vmem:[#allocation9 + $0x158] sm:$0xff]  ;;  %v3080_v30 = vld [vmem:[#allocation9 + $0x140] sm:$0xff]  ;;  %v3082_v31 = vld [vmem:[#allocation9 + $0x150] sm:$0xff] }
  0x3f   : > { %654 = vmatpush1.msra.mxu0 %v3032_v14  ;;  %725 = vmatpush1.msra.mxu1 %v3034_v15  ;;  %v3086_v32 = vld [vmem:[#allocation9 + $0x128] sm:$0xff]  ;;  %v3088_v33 = vld [vmem:[#allocation9 + $0x138] sm:$0xff]  ;;  %v3092_v34 = vld [vmem:[#allocation9 + $0x120] sm:$0xff] }
  0x40   : > { %655 = vmatprep.subr.mxu0 %v3038_v16  ;;  %726 = vmatprep.subr.mxu1 %v3040_v17  ;;  %v3094_v35 = vld [vmem:[#allocation9 + $0x130] sm:$0xff]  ;;  %v3098_v36 = vld [vmem:[#allocation9 + $0x108] sm:$0xff]  ;;  %v3100_v37 = vld [vmem:[#allocation9 + $0x118] sm:$0xff] }
  0x41   : > { %656 = vmatpush1.msra.mxu0 %v3044_v18  ;;  %727 = vmatpush1.msra.mxu1 %v3046_v19  ;;  %v3104_v38 = vld [vmem:[#allocation9 + $0x100] sm:$0xff]  ;;  %v3106_v39 = vld [vmem:[#allocation9 + $0x110] sm:$0xff]  ;;  %v3110_v40 = vld [vmem:[#allocation9 + $0xe8] sm:$0xff] }
  0x42   : > { %657 = vmatprep.subr.mxu0 %v3050_v20  ;;  %728 = vmatprep.subr.mxu1 %v3052_v21  ;;  %v3112_v41 = vld [vmem:[#allocation9 + $0xf8] sm:$0xff]  ;;  %v3116_v42 = vld [vmem:[#allocation9 + $0xe0] sm:$0xff]  ;;  %v3120_v43 = vld [vmem:[#allocation9 + $0xf0] sm:$0xff] }
  0x43   : > { %658 = vmatpush1.msra.mxu0 %v3056_v22  ;;  %729 = vmatpush1.msra.mxu1 %v3058_v23  ;;  %v334_v44 = vld [vmem:[%s3003_s26 + $0x8] sm:$0xff]  ;;  %v3127_v46 = vld [vmem:[#allocation9 + $0xd8] sm:$0xff]  ;;  %v3135_v48 = vld [vmem:[#allocation9 + $0xd0] sm:$0xff] }
  0x44   : > { %659 = vmatprep.subr.mxu0 %v3062_v24  ;;  %730 = vmatprep.subr.mxu1 %v3064_v25  ;;  %v3125_v45 = vld [vmem:[#allocation9 + $0xc8] sm:$0xff]  ;;  %v3131_v47 = vld [vmem:[#allocation9 + $0xc0] sm:$0xff]  ;;  %v3141_v50 = vld [vmem:[#allocation9 + $0xb8] sm:$0xff] }
  0x45   : > { %660 = vmatpush1.msra.mxu0 %v3068_v26  ;;  %731 = vmatpush1.msra.mxu1 %v3070_v27  ;;  %v3137_v49 = vld [vmem:[#allocation9 + $0xa8] sm:$0xff]  ;;  %4170 = vst [vmem:[#allocation16_spill] sm:$0xff] %v3141_v50  ;;  %v3145_v51 = vld [vmem:[#allocation9 + $0xa0] sm:$0xff]  ;;  %v3149_v52 = vld [vmem:[#allocation9 + $0xb0] sm:$0xff] }
  0x46   : > { %661 = vmatprep.subr.mxu0 %v3074_v28  ;;  %732 = vmatprep.subr.mxu1 %v3076_v29  ;;  %4169 = vst [vmem:[#allocation15_spill] sm:$0xff] %v3137_v49  ;;  %4171 = vst [vmem:[#allocation17_spill] sm:$0xff] %v3145_v51  ;;  %v335_v53 = vld [vmem:[%s3003_s26 + $0x10] sm:$0xff]  ;;  %v3156_v55 = vld [vmem:[#allocation9 + $0x98] sm:$0xff] }
  0x47   : > { %662 = vmatpush1.msra.mxu0 %v3080_v30  ;;  %733 = vmatpush1.msra.mxu1 %v3082_v31  ;;  %4172 = vst [vmem:[#allocation18_spill] sm:$0xff] %v3149_v52  ;;  %v3154_v54 = vld [vmem:[#allocation9 + $0x88] sm:$0xff]  ;;  %4174 = vst [vmem:[#allocation20_spill] sm:$0xff] %v3156_v55  ;;  %v3160_v56 = vld [vmem:[#allocation9 + $0x80] sm:$0xff] }
  0x48   : > { %663 = vmatprep.subr.mxu0 %v3086_v32  ;;  %734 = vmatprep.subr.mxu1 %v3088_v33  ;;  %4173 = vst [vmem:[#allocation19_spill] sm:$0xff] %v3154_v54  ;;  %4175 = vst [vmem:[#allocation21_spill] sm:$0xff] %v3160_v56  ;;  %v3164_v57 = vld [vmem:[#allocation9 + $0x90] sm:$0xff]  ;;  %v3166_v58 = vld [vmem:[#allocation9 + $0x68] sm:$0xff] }
  0x49   : > { %664 = vmatpush1.msra.mxu0 %v3092_v34  ;;  %735 = vmatpush1.msra.mxu1 %v3094_v35  ;;  %4176 = vst [vmem:[#allocation22_spill] sm:$0xff] %v3164_v57  ;;  %4177 = vst [vmem:[#allocation23_spill] sm:$0xff] %v3166_v58  ;;  %v3170_v59 = vld [vmem:[#allocation9 + $0x78] sm:$0xff]  ;;  %v3174_v60 = vld [vmem:[#allocation9 + $0x60] sm:$0xff] }
  0x4a   : > { %665 = vmatprep.subr.mxu0 %v3098_v36  ;;  %736 = vmatprep.subr.mxu1 %v3100_v37  ;;  %4178 = vst [vmem:[#allocation24_spill] sm:$0xff] %v3170_v59  ;;  %4179 = vst [vmem:[#allocation25_spill] sm:$0xff] %v3174_v60  ;;  %v3178_v61 = vld [vmem:[#allocation9 + $0x70] sm:$0xff]  ;;  %v3183_v63 = vld [vmem:[#allocation9 + $0x48] sm:$0xff] }
  0x4b   : > { %666 = vmatpush1.msra.mxu0 %v3104_v38  ;;  %737 = vmatpush1.msra.mxu1 %v3106_v39  ;;  %4180 = vst [vmem:[#allocation26_spill] sm:$0xff] %v3178_v61  ;;  %v336_v62 = vld [vmem:[%s3003_s26 + $0x18] sm:$0xff]  ;;  %4181 = vst [vmem:[#allocation27_spill] sm:$0xff] %v3183_v63  ;;  %v3189_v1 = vld [vmem:[#allocation9 + $0x40] sm:$0xff] }
  0x4c   : > { %667 = vmatprep.subr.mxu0 %v3110_v40  ;;  %738 = vmatprep.subr.mxu1 %v3112_v41  ;;  %v3185_v0 = vld [vmem:[#allocation9 + $0x58] sm:$0xff]  ;;  %4183 = vst [vmem:[#allocation29_spill] sm:$0xff] %v3189_v1  ;;  %v3193_v2 = vld [vmem:[#allocation9 + $0x50] sm:$0xff]  ;;  %v3195_v3 = vld [vmem:[#allocation9 + $0x28] sm:$0xff] }
  0x4d   : > { %457 = vmatprep.mubr.f32.mxu0 %v4053_v6  ;;  %668 = vmatpush1.msra.mxu0 %v3116_v42  ;;  %4182 = vst [vmem:[#allocation28_spill] sm:$0xff] %v3185_v0  ;;  %4184 = vst [vmem:[#allocation30_spill] sm:$0xff] %v3193_v2  ;;  %v3199_v4 = vld [vmem:[#allocation9 + $0x38] sm:$0xff]  ;;  %v3203_v5 = vld [vmem:[#allocation9 + $0x20] sm:$0xff] }
  0x4e   : > { %739 = vmatpush1.msra.mxu1 %v3120_v43  ;;  %2569 = vmatmul.mubr.msk.f32.gmra.mxu0 %vm365_vm1, %v334_v44  ;;  %4185 = vst [vmem:[#allocation31_spill] sm:$0xff] %v3195_v3  ;;  %4186 = vst [vmem:[#allocation32_spill] sm:$0xff] %v3199_v4  ;;  %v3205_v7 = vld [vmem:[#allocation9 + $0x30] sm:$0xff] }
  0x4f   : > { %669 = vmatprep.subr.mxu0 %v3125_v45  ;;  %740 = vmatprep.subr.mxu1 %v3127_v46  ;;  %4187 = vst [vmem:[#allocation33_spill] sm:$0xff] %v3203_v5  ;;  %4188 = vst [vmem:[#allocation34_spill] sm:$0xff] %v3205_v7 }
  0x50   : > { %546 = vmatprep.mubr.f32.mxu1 %v4053_v6  ;;  %670 = vmatpush1.msra.mxu0 %v3131_v47 }
  0x51   : > { %741 = vmatpush1.msra.mxu1 %v3135_v48  ;;  %671 = vmatprep.subr.mxu0 %v3137_v49 }
  0x52   : > { %2575 = vmatmul.mubr.msk.f32.gmra.mxu1 %vm365_vm1, %v334_v44  ;;  %742 = vmatprep.subr.mxu1 %v3141_v50  ;;  %v3209_v44 = vld [vmem:[#allocation9 + $0x8] sm:$0xff] }
  0x53   : > { %463 = vmatprep.mubr.f32.mxu0 %v4053_v6  ;;  %672 = vmatpush1.msra.mxu0 %v3145_v51  ;;  %4189 = vst [vmem:[#allocation35_spill] sm:$0xff] %v3209_v44 }
  0x54   : > { %743 = vmatpush1.msra.mxu1 %v3149_v52  ;;  %2570 = vmatmul.mubr.msk.f32.gmra.mxu0 %vm365_vm1, %v335_v53 }
  0x55   : > { %673 = vmatprep.subr.mxu0 %v3154_v54  ;;  %744 = vmatprep.subr.mxu1 %v3156_v55 }
  0x56   : > { %552 = vmatprep.mubr.f32.mxu1 %v4053_v6  ;;  %674 = vmatpush1.msra.mxu0 %v3160_v56 }
  0x57   : > { %745 = vmatpush1.msra.mxu1 %v3164_v57  ;;  %675 = vmatprep.subr.mxu0 %v3166_v58 }
  0x58   : > { %2576 = vmatmul.mubr.msk.f32.gmra.mxu1 %vm365_vm1, %v335_v53  ;;  %746 = vmatprep.subr.mxu1 %v3170_v59  ;;  %v3211_v53 = vld [vmem:[#allocation9 + $0x18] sm:$0xff] }
  0x59   : > { %469 = vmatprep.mubr.f32.mxu0 %v4053_v6  ;;  %676 = vmatpush1.msra.mxu0 %v3174_v60  ;;  %4190 = vst [vmem:[#allocation36_spill] sm:$0xff] %v3211_v53 }
  0x5a   : > { %747 = vmatpush1.msra.mxu1 %v3178_v61  ;;  %2571 = vmatmul.mubr.msk.f32.gmra.mxu0 %vm365_vm1, %v336_v62 }
  0x5b   : > { %677 = vmatprep.subr.mxu0 %v3183_v63  ;;  %748 = vmatprep.subr.mxu1 %v3185_v0  ;;  %v3215_v0 = vld [vmem:[#allocation9] sm:$0xff] }
  0x5c   : > { %558 = vmatprep.mubr.f32.mxu1 %v4053_v6  ;;  %678 = vmatpush1.msra.mxu0 %v3189_v1  ;;  %4191 = vst [vmem:[#allocation37_spill] sm:$0xff] %v3215_v0  ;;  %v3219_v6 = vld [vmem:[#allocation9 + $0x10] sm:$0xff] }
  0x5d   : > { %749 = vmatpush1.msra.mxu1 %v3193_v2  ;;  %679 = vmatprep.subr.mxu0 %v3195_v3  ;;  %4192 = vst [vmem:[#allocation38_spill] sm:$0xff] %v3219_v6  ;;  %v645_v3 = vld [vmem:[#allocation4] sm:$0xff]  ;;  %v4193_v2 = vmov 0.0  }
  0x5e   : > { %2577 = vmatmul.mubr.msk.f32.gmra.mxu1 %vm365_vm1, %v336_v62  ;;  %750 = vmatprep.subr.mxu1 %v3199_v4  ;;  %v4194_v62 = vld [vmem:[#allocation28_spill] sm:$0xff] }
  0x5f   : > { %680 = vmatpush1.msra.mxu0 %v3203_v5  ;;  %751 = vmatpush1.msra.mxu1 %v3205_v7 }
  0x60   : > { %681 = vmatprep.subr.mxu0 %v3209_v44  ;;  %752 = vmatprep.subr.mxu1 %v3211_v53 }
  0x61   : > { %682 = vmatpush1.msra.mxu0 %v3215_v0  ;;  %715 = vmatprep.mubr.f32.mxu0 %v4193_v2 }
  0x62   : > { %753 = vmatpush1.msra.mxu1 %v3219_v6  ;;  %786 = vmatprep.mubr.f32.mxu1 %v4193_v2 }
  0x63   : > { %716 = vmatmul.mubr.f32.vlgmr.msra.gmra.mxu0 %v645_v3  ;;  %787 = vmatmul.mubr.f32.vlgmr.msra.gmra.mxu1 %v645_v3  ;;  %v4195_v3 = vld [vmem:[#allocation30_spill] sm:$0xff] }
  0x64   : > { %827 = vmatprep.subr.mxu0 %v3016_v8  ;;  %898 = vmatprep.subr.mxu1 %v3018_v9 }
  0x65   : > { %828 = vmatpush1.msra.mxu0 %v3020_v10  ;;  %899 = vmatpush1.msra.mxu1 %v3022_v11 }
  0x66   : > { %829 = vmatprep.subr.mxu0 %v3026_v12  ;;  %900 = vmatprep.subr.mxu1 %v3028_v13 }
  0x67   : > { %830 = vmatpush1.msra.mxu0 %v3032_v14  ;;  %901 = vmatpush1.msra.mxu1 %v3034_v15 }
  0x68   : > { %831 = vmatprep.subr.mxu0 %v3038_v16  ;;  %902 = vmatprep.subr.mxu1 %v3040_v17 }
  0x69   : > { %832 = vmatpush1.msra.mxu0 %v3044_v18  ;;  %903 = vmatpush1.msra.mxu1 %v3046_v19 }
  0x6a   : > { %833 = vmatprep.subr.mxu0 %v3050_v20  ;;  %904 = vmatprep.subr.mxu1 %v3052_v21 }
  0x6b   : > { %834 = vmatpush1.msra.mxu0 %v3056_v22  ;;  %905 = vmatpush1.msra.mxu1 %v3058_v23 }
  0x6c   : > { %835 = vmatprep.subr.mxu0 %v3062_v24  ;;  %906 = vmatprep.subr.mxu1 %v3064_v25 }
  0x6d   : > { %836 = vmatpush1.msra.mxu0 %v3068_v26  ;;  %907 = vmatpush1.msra.mxu1 %v3070_v27 }
  0x6e   : > { %837 = vmatprep.subr.mxu0 %v3074_v28  ;;  %908 = vmatprep.subr.mxu1 %v3076_v29 }
  0x6f   : > { %838 = vmatpush1.msra.mxu0 %v3080_v30  ;;  %909 = vmatpush1.msra.mxu1 %v3082_v31 }
  0x70   : > { %839 = vmatprep.subr.mxu0 %v3086_v32  ;;  %910 = vmatprep.subr.mxu1 %v3088_v33 }
  0x71   : > { %840 = vmatpush1.msra.mxu0 %v3092_v34  ;;  %911 = vmatpush1.msra.mxu1 %v3094_v35 }
  0x72   : > { %841 = vmatprep.subr.mxu0 %v3098_v36  ;;  %912 = vmatprep.subr.mxu1 %v3100_v37 }
  0x73   : > { %842 = vmatpush1.msra.mxu0 %v3104_v38  ;;  %913 = vmatpush1.msra.mxu1 %v3106_v39 }
  0x74   : > { %843 = vmatprep.subr.mxu0 %v3110_v40  ;;  %914 = vmatprep.subr.mxu1 %v3112_v41 }
  0x75   : > { %844 = vmatpush1.msra.mxu0 %v3116_v42  ;;  %915 = vmatpush1.msra.mxu1 %v3120_v43 }
  0x76   : > { %845 = vmatprep.subr.mxu0 %v3125_v45  ;;  %916 = vmatprep.subr.mxu1 %v3127_v46 }
  0x77   : > { %846 = vmatpush1.msra.mxu0 %v3131_v47  ;;  %917 = vmatpush1.msra.mxu1 %v3135_v48 }
  0x78   : > { %847 = vmatprep.subr.mxu0 %v3137_v49  ;;  %918 = vmatprep.subr.mxu1 %v3141_v50 }
  0x79   : > { %848 = vmatpush1.msra.mxu0 %v3145_v51  ;;  %919 = vmatpush1.msra.mxu1 %v3149_v52 }
  0x7a   : > { %849 = vmatprep.subr.mxu0 %v3154_v54  ;;  %920 = vmatprep.subr.mxu1 %v3156_v55  ;;  %v4196_v55 = vld [vmem:[#allocation31_spill] sm:$0xff] }
  0x7b   : > { %850 = vmatpush1.msra.mxu0 %v3160_v56  ;;  %921 = vmatpush1.msra.mxu1 %v3164_v57 }
  0x7c   : > { %851 = vmatprep.subr.mxu0 %v3166_v58  ;;  %922 = vmatprep.subr.mxu1 %v3170_v59 }
  0x7d   : > { %852 = vmatpush1.msra.mxu0 %v3174_v60  ;;  %923 = vmatpush1.msra.mxu1 %v3178_v61 }
  0x7e   : > { %853 = vmatprep.subr.mxu0 %v3183_v63  ;;  %924 = vmatprep.subr.mxu1 %v4194_v62 }
  0x7f   : > { %854 = vmatpush1.msra.mxu0 %v3189_v1  ;;  %925 = vmatpush1.msra.mxu1 %v4195_v3 }
  0x80   : > { %855 = vmatprep.subr.mxu0 %v4196_v55  ;;  %926 = vmatprep.subr.mxu1 %v3199_v4  ;;  %v341_v4 = vlaneseq }
  0x81   : > { %856 = vmatpush1.msra.mxu0 %v3203_v5  ;;  %927 = vmatpush1.msra.mxu1 %v3205_v7 }
  0x82   : > { %857 = vmatprep.subr.mxu0 %v3209_v44  ;;  %928 = vmatprep.subr.mxu1 %v3211_v53  ;;  %v3295_v5 = vshrl.u32 %v341_v4, 7 }
  0x83   : > { %858 = vmatpush1.msra.mxu0 %v3215_v0  ;;  %891 = vmatprep.mubr.f32.mxu0 %v4193_v2  ;;  %v339_v0 = vld [vmem:[%s4044_s2] sm:$0xf] }
  0x84   : > { %929 = vmatpush1.msra.mxu1 %v3219_v6  ;;  %962 = vmatprep.mubr.f32.mxu1 %v4193_v2  ;;  %4197 = vst [vmem:[#allocation39_spill] sm:$0xff] %v3295_v5  ;;  %v4088_v44 = vsub.s32 0, %v3295_v5  ;;  %v4097_v55 = vsub.s32 1, %v3295_v5  ;;  %v4105_v62 = vsub.s32 3, %v3295_v5 }
  0x85   : > { %1004 = vmatprep.subr.mxu0 %v3016_v8  ;;  %1075 = vmatprep.subr.mxu1 %v3018_v9  ;;  %v4102_v8 = vsub.s32 2, %v3295_v5 }
  0x86   : > { %v344_v2 = vrot.slane %v339_v0, %v4088_v44  ;;  %v348_v4 = vrot.slane %v339_v0, %v4097_v55  ;;  %v356_v44 = vrot.slane %v339_v0, %v4105_v62 }
  0x87   : > { %v352_v61 = vrot.slane %v339_v0, %v4102_v8 }
  0xfb   : > { %v453_v7 = vpop.f32.mrf.mxu0 }
  0xfc   : > { %v542_v53 = vpop.f32.mrf.mxu1 }
  0xfd   : > { %v455_v6 = vpop.f32.mrf.mxu0 }
  0xfe   : > { %v544_v3 = vpop.f32.mrf.mxu1 }
 0x10e   : > { %v459_v9 = vpop.f32.mrf.mxu0 }
 0x10f   : > { %v3307_v1 = vadd.f32 %v459_v9, %v344_v2 }
 0x110   : > { %v461_v63 = vpop.f32.mrf.mxu0 }
 0x111   : > { %4198 = vst [vmem:[#allocation40_spill] sm:$0xff] %v3307_v1  ;;  %v3312_v60 = vadd.f32 %v461_v63, %v348_v4 }
 0x112   : > { %v548_v59 = vpop.f32.mrf.mxu1 }
 0x113   : > { %4199 = vst [vmem:[#allocation41_spill] sm:$0xff] %v3312_v60  ;;  %v3316_v58 = vadd.f32 %v548_v59, %v352_v61 }
 0x114   : > { %v465_v57 = vpop.f32.mrf.mxu0  ;;  %v550_v56 = vpop.f32.mrf.mxu1 }
 0x115   : > { %4200 = vst [vmem:[#allocation42_spill] sm:$0xff] %v3316_v58  ;;  %v3318_v54 = vadd.f32 %v465_v57, %v344_v2  ;;  %v3320_v9 = vadd.f32 %v550_v56, %v356_v44  ;;  %v456_v58 = vadd.f32 %v455_v6, %v348_v4 }
 0x116   : > { %v467_v55 = vpop.f32.mrf.mxu0 }
 0x117   : > { %4201 = vst [vmem:[#allocation43_spill] sm:$0xff] %v3318_v54  ;;  %4202 = vst [vmem:[#allocation44_spill] sm:$0xff] %v3320_v9  ;;  %v3322_v1 = vadd.f32 %v467_v55, %v348_v4  ;;  %v454_v55 = vadd.f32 %v453_v7, %v344_v2 }
 0x118   : > { %v554_v52 = vpop.f32.mrf.mxu1 }
 0x119   : > { %4203 = vst [vmem:[#allocation45_spill] sm:$0xff] %v3322_v1  ;;  %v3324_v51 = vadd.f32 %v554_v52, %v352_v61 }
 0x11a   : > { %v471_v63 = vpop.f32.mrf.mxu0  ;;  %v556_v8 = vpop.f32.mrf.mxu1 }
 0x11b   : > { %4204 = vst [vmem:[#allocation46_spill] sm:$0xff] %v3324_v51  ;;  %v3326_v60 = vadd.f32 %v471_v63, %v344_v2  ;;  %v3328_v5 = vadd.f32 %v556_v8, %v356_v44 }
 0x11c   : > { %v473_v59 = vpop.f32.mrf.mxu0 }
 0x11d   : > { %4205 = vst [vmem:[#allocation47_spill] sm:$0xff] %v3326_v60  ;;  %4206 = vst [vmem:[#allocation48_spill] sm:$0xff] %v3328_v5  ;;  %v3330_v0 = vadd.f32 %v473_v59, %v348_v4  ;;  %v545_v59 = vadd.f32 %v544_v3, %v356_v44  ;;  %v543_v5 = vadd.f32 %v542_v53, %v352_v61  ;;  %v4213_v3 = vld [vmem:[#allocation17_spill] sm:$0xff] }
 0x11e   : > { %v560_v62 = vpop.f32.mrf.mxu1 }
 0x11f   : > { %4207 = vst [vmem:[#allocation49_spill] sm:$0xff] %v3330_v0  ;;  %v3332_v57 = vadd.f32 %v560_v62, %v352_v61 }
 0x120   : > { %v562_v56 = vpop.f32.mrf.mxu1 }
 0x121   : > { %4208 = vst [vmem:[#allocation50_spill] sm:$0xff] %v3332_v57  ;;  %v3334_v54 = vadd.f32 %v562_v56, %v356_v44 }
 0x123   : > { %4209 = vst [vmem:[#allocation51_spill] sm:$0xff] %v3334_v54  ;;  %v717_v1 = vpop.f32.mrf.mxu0  ;;  %v788_v63 = vpop.f32.mrf.mxu1 }
 0x124   : > { %v793_v52 = vadd.f32 %v717_v1, %v454_v55  ;;  %v795_v49 = vadd.f32 %v788_v63, %v543_v5  ;;  %v4217_v55 = vld [vmem:[#allocation21_spill] sm:$0xff]  ;;  %v4219_v63 = vld [vmem:[#allocation23_spill] sm:$0xff] }
 0x125   : > { %v719_v51 = vpop.f32.mrf.mxu0  ;;  %v790_v60 = vpop.f32.mrf.mxu1 }
 0x126   : > { %v2578_v9 = vmul.f32 -1.442695, %v793_v52  ;;  %v794_v50 = vadd.f32 %v719_v51, %v456_v58  ;;  %v796_v0 = vadd.f32 %v790_v60, %v545_v59  ;;  %v646_v58 = vld [vmem:[#allocation5 + $0x8] sm:$0xff]  ;;  %v4218_v52 = vld [vmem:[#allocation22_spill] sm:$0xff]  ;;  %v4221_v59 = vld [vmem:[#allocation25_spill] sm:$0xff] }
 0x128   : > { %2695 = vpow2.f32 %v2578_v9  ;;  %v2579_v8 = vmul.f32 -1.442695, %v794_v50  ;;  %v2580_v62 = vmul.f32 -1.442695, %v796_v0  ;;  %v4214_v9 = vld [vmem:[#allocation18_spill] sm:$0xff]  ;;  %v4215_v0 = vld [vmem:[#allocation19_spill] sm:$0xff] }
 0x12a   : > { %2697 = vpow2.f32 %v2579_v8  ;;  %v4220_v8 = vld [vmem:[#allocation24_spill] sm:$0xff] }
 0x12b   : > { %2699 = vpow2.f32 %v2580_v62  ;;  %v4222_v62 = vld [vmem:[#allocation26_spill] sm:$0xff] }
 0x135   : > { %v2696_v57 = vpop.eup %2695 }
 0x136   : > { %v800_v56 = vadd.f32 1.0, %v2696_v57  ;;  %v4216_v57 = vld [vmem:[#allocation20_spill] sm:$0xff] }
 0x137   : > { %v2698_v54 = vpop.eup %2697 }
 0x138   : > { %2701 = vrcp.f32 %v800_v56  ;;  %v806_v6 = vadd.f32 1.0, %v2698_v54  ;;  %v2700_v1 = vpop.eup %2699  ;;  %v4212_v54 = vld [vmem:[#allocation16_spill] sm:$0xff]  ;;  %v4223_v56 = vld [vmem:[#allocation27_spill] sm:$0xff] }
 0x139   : > { %2703 = vtanh.f32 %v795_v49  ;;  %v813_v7 = vadd.f32 1.0, %v2700_v1  ;;  %v4211_v49 = vld [vmem:[#allocation15_spill] sm:$0xff]  ;;  %v4225_v1 = vld [vmem:[#allocation29_spill] sm:$0xff] }
 0x13a   : > { %2705 = vrcp.f32 %v806_v6  ;;  %v4224_v6 = vld [vmem:[#allocation28_spill] sm:$0xff] }
 0x13b   : > { %2707 = vrcp.f32 %v813_v7  ;;  %v4230_v7 = vld [vmem:[#allocation34_spill] sm:$0xff] }
 0x145   : > { %v2702_v51 = vpop.eup %2701 }
 0x146   : > { %v2704_v2 = vpop.eup %2703 }
 0x147   : > { %v2706_v50 = vpop.eup %2705  ;;  %v817_v4 = vmul.f32 %v2704_v2, %v2702_v51  ;;  %v4226_v51 = vld [vmem:[#allocation30_spill] sm:$0xff]  ;;  %v4228_v2 = vld [vmem:[#allocation32_spill] sm:$0xff] }
 0x148   : > { %v816_v44 = vmul.f32 %v2706_v50, %v646_v58  ;;  %v2708_v61 = vpop.eup %2707  ;;  %v4227_v58 = vld [vmem:[#allocation31_spill] sm:$0xff]  ;;  %v4229_v50 = vld [vmem:[#allocation33_spill] sm:$0xff] }
 0x14a   : > { %v3336_v60 = vadd.f32 %v817_v4, %v816_v44  ;;  %v4231_v4 = vld [vmem:[#allocation35_spill] sm:$0xff]  ;;  %v4232_v44 = vld [vmem:[#allocation36_spill] sm:$0xff] }
 0x14c   : > { %2709 = vtanh.f32 %v3336_v60 }
 0x159   : > { %v2710_v5 = vpop.eup %2709 }
 0x15a   : > { %v3339_v53 = vmul.f32 %v2710_v5, %v2708_v61  ;;  %v4233_v61 = vld [vmem:[#allocation37_spill] sm:$0xff]  ;;  %v4234_v5 = vmov 0.0  }
 0x15c   : > { %4210 = vst [vmem:[#allocation52_spill] sm:$0xff] %v3339_v53  ;;  %892 = vmatmul.mubr.f32.vlgmr.msra.gmra.mxu0 %v3339_v53  ;;  %963 = vmatmul.mubr.f32.vlgmr.msra.gmra.mxu1 %v3339_v53  ;;  %v4235_v53 = vld [vmem:[#allocation38_spill] sm:$0xff] }
 0x15d   : > { %1005 = vmatpush1.msra.mxu0 %v3020_v10  ;;  %1076 = vmatpush1.msra.mxu1 %v3022_v11 }
 0x15e   : > { %1006 = vmatprep.subr.mxu0 %v3026_v12  ;;  %1077 = vmatprep.subr.mxu1 %v3028_v13 }
 0x15f   : > { %1007 = vmatpush1.msra.mxu0 %v3032_v14  ;;  %1078 = vmatpush1.msra.mxu1 %v3034_v15 }
 0x160   : > { %1008 = vmatprep.subr.mxu0 %v3038_v16  ;;  %1079 = vmatprep.subr.mxu1 %v3040_v17 }
 0x161   : > { %1009 = vmatpush1.msra.mxu0 %v3044_v18  ;;  %1080 = vmatpush1.msra.mxu1 %v3046_v19 }
 0x162   : > { %1010 = vmatprep.subr.mxu0 %v3050_v20  ;;  %1081 = vmatprep.subr.mxu1 %v3052_v21 }
 0x163   : > { %1011 = vmatpush1.msra.mxu0 %v3056_v22  ;;  %1082 = vmatpush1.msra.mxu1 %v3058_v23 }
 0x164   : > { %1012 = vmatprep.subr.mxu0 %v3062_v24  ;;  %1083 = vmatprep.subr.mxu1 %v3064_v25 }
 0x165   : > { %1013 = vmatpush1.msra.mxu0 %v3068_v26  ;;  %1084 = vmatpush1.msra.mxu1 %v3070_v27 }
 0x166   : > { %1014 = vmatprep.subr.mxu0 %v3074_v28  ;;  %1085 = vmatprep.subr.mxu1 %v3076_v29 }
 0x167   : > { %1015 = vmatpush1.msra.mxu0 %v3080_v30  ;;  %1086 = vmatpush1.msra.mxu1 %v3082_v31 }
 0x168   : > { %1016 = vmatprep.subr.mxu0 %v3086_v32  ;;  %1087 = vmatprep.subr.mxu1 %v3088_v33 }
 0x169   : > { %1017 = vmatpush1.msra.mxu0 %v3092_v34  ;;  %1088 = vmatpush1.msra.mxu1 %v3094_v35 }
 0x16a   : > { %1018 = vmatprep.subr.mxu0 %v3098_v36  ;;  %1089 = vmatprep.subr.mxu1 %v3100_v37 }
 0x16b   : > { %1019 = vmatpush1.msra.mxu0 %v3104_v38  ;;  %1090 = vmatpush1.msra.mxu1 %v3106_v39 }
 0x16c   : > { %1020 = vmatprep.subr.mxu0 %v3110_v40  ;;  %1091 = vmatprep.subr.mxu1 %v3112_v41 }
 0x16d   : > { %1021 = vmatpush1.msra.mxu0 %v3116_v42  ;;  %1092 = vmatpush1.msra.mxu1 %v3120_v43 }
 0x16e   : > { %1022 = vmatprep.subr.mxu0 %v3125_v45  ;;  %1093 = vmatprep.subr.mxu1 %v3127_v46 }
 0x16f   : > { %1023 = vmatpush1.msra.mxu0 %v3131_v47  ;;  %1094 = vmatpush1.msra.mxu1 %v3135_v48 }
 0x170   : > { %1024 = vmatprep.subr.mxu0 %v4211_v49  ;;  %1095 = vmatprep.subr.mxu1 %v4212_v54 }
 0x171   : > { %1025 = vmatpush1.msra.mxu0 %v4213_v3  ;;  %1096 = vmatpush1.msra.mxu1 %v4214_v9 }
 0x172   : > { %1026 = vmatprep.subr.mxu0 %v4215_v0  ;;  %1097 = vmatprep.subr.mxu1 %v4216_v57 }
 0x173   : > { %1027 = vmatpush1.msra.mxu0 %v4217_v55  ;;  %1098 = vmatpush1.msra.mxu1 %v4218_v52 }
 0x174   : > { %1028 = vmatprep.subr.mxu0 %v4219_v63  ;;  %1099 = vmatprep.subr.mxu1 %v4220_v8  ;;  %v4241_v8 = vld [vmem:[#allocation42_spill] sm:$0xff] }
 0x175   : > { %1029 = vmatpush1.msra.mxu0 %v4221_v59  ;;  %1100 = vmatpush1.msra.mxu1 %v4222_v62  ;;  %v4240_v59 = vld [vmem:[#allocation44_spill] sm:$0xff] }
 0x176   : > { %1030 = vmatprep.subr.mxu0 %v4223_v56  ;;  %1101 = vmatprep.subr.mxu1 %v4224_v6 }
 0x177   : > { %1031 = vmatpush1.msra.mxu0 %v4225_v1  ;;  %1102 = vmatpush1.msra.mxu1 %v4226_v51  ;;  %v4236_v51 = vld [vmem:[#allocation13_spill] sm:$0xff] }
 0x178   : > { %1032 = vmatprep.subr.mxu0 %v4227_v58  ;;  %1103 = vmatprep.subr.mxu1 %v4228_v2  ;;  %v4237_v58 = vld [vmem:[#allocation14_spill] sm:$0xff] }
 0x179   : > { %1033 = vmatpush1.msra.mxu0 %v4229_v50  ;;  %1104 = vmatpush1.msra.mxu1 %v4230_v7  ;;  %v4238_v50 = vld [vmem:[#allocation40_spill] sm:$0xff] }
 0x17a   : > { %1034 = vmatprep.subr.mxu0 %v4231_v4  ;;  %1105 = vmatprep.subr.mxu1 %v4232_v44  ;;  %v4239_v4 = vld [vmem:[#allocation41_spill] sm:$0xff] }
 0x17b   : > { %1035 = vmatpush1.msra.mxu0 %v4233_v61  ;;  %1068 = vmatprep.mubr.f32.mxu0 %v4234_v5 }
 0x17c   : > { %1106 = vmatpush1.msra.mxu1 %v4235_v53  ;;  %1139 = vmatprep.mubr.f32.mxu1 %v4234_v5 }
 0x17d   : > { %1181 = vmatprep.subr.mxu0 %v4236_v51  ;;  %1252 = vmatprep.subr.mxu1 %v4237_v58 }
 0x21c   : > { %v893_v2 = vpop.f32.mrf.mxu0  ;;  %v964_v44 = vpop.f32.mrf.mxu1 }
 0x21d   : > { %v969_v1 = vadd.f32 %v893_v2, %v4238_v50  ;;  %v971_v5 = vadd.f32 %v964_v44, %v4241_v8 }
 0x21e   : > { %v895_v7 = vpop.f32.mrf.mxu0  ;;  %v966_v62 = vpop.f32.mrf.mxu1 }
 0x21f   : > { %v2581_v6 = vmul.f32 -1.442695, %v969_v1  ;;  %v970_v56 = vadd.f32 %v895_v7, %v4239_v4  ;;  %v972_v53 = vadd.f32 %v966_v62, %v4240_v59 }
 0x221   : > { %2711 = vpow2.f32 %v2581_v6  ;;  %v2582_v61 = vmul.f32 -1.442695, %v970_v56  ;;  %v2583_v63 = vmul.f32 -1.442695, %v972_v53 }
 0x223   : > { %2713 = vpow2.f32 %v2582_v61 }
 0x224   : > { %2715 = vtanh.f32 %v971_v5 }
 0x225   : > { %2717 = vpow2.f32 %v2583_v63 }
 0x22e   : > { %v2712_v51 = vpop.eup %2711 }
 0x22f   : > { %v976_v52 = vadd.f32 1.0, %v2712_v51  ;;  %v1419_v51 = vld [vmem:[#allocation7 + $0x1e0] sm:$0xff] }
 0x230   : > { %v2714_v58 = vpop.eup %2713 }
 0x231   : > { %2719 = vrcp.f32 %v976_v52  ;;  %v982_v2 = vadd.f32 1.0, %v2714_v58  ;;  %v2716_v1 = vpop.eup %2715  ;;  %v1421_v58 = vld [vmem:[#allocation7 + $0x1f0] sm:$0xff] }
 0x232   : > { %v2718_v50 = vpop.eup %2717 }
 0x233   : > { %2721 = vrcp.f32 %v982_v2  ;;  %v989_v4 = vadd.f32 1.0, %v2718_v50  ;;  %v1416_v2 = vld [vmem:[#allocation7 + $0x1c8] sm:$0xff]  ;;  %v1415_v50 = vld [vmem:[#allocation7 + $0x1c0] sm:$0xff] }
 0x235   : > { %2723 = vrcp.f32 %v989_v4  ;;  %v1411_v4 = vld [vmem:[#allocation7 + $0x1a0] sm:$0xff] }
 0x23e   : > { %v2720_v6 = vpop.eup %2719 }
 0x23f   : > { %v993_v7 = vmul.f32 %v2720_v6, %v2716_v1  ;;  %v1418_v1 = vld [vmem:[#allocation7 + $0x1d8] sm:$0xff]  ;;  %v1417_v6 = vld [vmem:[#allocation7 + $0x1d0] sm:$0xff] }
 0x240   : > { %v2722_v56 = vpop.eup %2721 }
 0x241   : > { %v992_v61 = vmul.f32 %v2722_v56, %v3336_v60  ;;  %v1414_v56 = vld [vmem:[#allocation7 + $0x1b8] sm:$0xff] }
 0x242   : > { %v2724_v53 = vpop.eup %2723 }
 0x243   : > { %v3414_v59 = vadd.f32 %v993_v7, %v992_v61  ;;  %v1412_v7 = vld [vmem:[#allocation7 + $0x1a8] sm:$0xff]  ;;  %v1413_v61 = vld [vmem:[#allocation7 + $0x1b0] sm:$0xff] }
 0x245   : > { %2725 = vtanh.f32 %v3414_v59 }
 0x252   : > { %v2726_v8 = vpop.eup %2725 }
 0x253   : > { %v3417_v62 = vmul.f32 %v2726_v8, %v2724_v53  ;;  %v1410_v53 = vld [vmem:[#allocation7 + $0x198] sm:$0xff]  ;;  %v1407_v8 = vld [vmem:[#allocation7 + $0x180] sm:$0xff] }
 0x255   : > { %1069 = vmatmul.mubr.f32.vlgmr.msra.gmra.mxu0 %v3417_v62  ;;  %1140 = vmatmul.mubr.f32.vlgmr.msra.gmra.mxu1 %v3417_v62 }
 0x256   : > { %1182 = vmatpush1.msra.mxu0 %v3020_v10  ;;  %1253 = vmatpush1.msra.mxu1 %v3022_v11  ;;  %v4242_v10 = vld [vmem:[#allocation22_spill] sm:$0xff]  ;;  %v4243_v11 = vld [vmem:[#allocation23_spill] sm:$0xff] }
 0x257   : > { %1183 = vmatprep.subr.mxu0 %v3026_v12  ;;  %1254 = vmatprep.subr.mxu1 %v3028_v13  ;;  %v4244_v12 = vld [vmem:[#allocation24_spill] sm:$0xff]  ;;  %v4245_v13 = vld [vmem:[#allocation25_spill] sm:$0xff] }
 0x258   : > { %1184 = vmatpush1.msra.mxu0 %v3032_v14  ;;  %1255 = vmatpush1.msra.mxu1 %v3034_v15  ;;  %v4246_v14 = vld [vmem:[#allocation26_spill] sm:$0xff]  ;;  %v4247_v15 = vld [vmem:[#allocation27_spill] sm:$0xff] }
 0x259   : > { %1185 = vmatprep.subr.mxu0 %v3038_v16  ;;  %1256 = vmatprep.subr.mxu1 %v3040_v17  ;;  %v4248_v16 = vld [vmem:[#allocation28_spill] sm:$0xff]  ;;  %v4249_v17 = vld [vmem:[#allocation29_spill] sm:$0xff] }
 0x25a   : > { %1186 = vmatpush1.msra.mxu0 %v3044_v18  ;;  %1257 = vmatpush1.msra.mxu1 %v3046_v19  ;;  %v4250_v18 = vld [vmem:[#allocation30_spill] sm:$0xff]  ;;  %v4251_v19 = vld [vmem:[#allocation31_spill] sm:$0xff] }
 0x25b   : > { %1187 = vmatprep.subr.mxu0 %v3050_v20  ;;  %1258 = vmatprep.subr.mxu1 %v3052_v21  ;;  %v4252_v20 = vld [vmem:[#allocation32_spill] sm:$0xff]  ;;  %v4253_v21 = vld [vmem:[#allocation33_spill] sm:$0xff] }
 0x25c   : > { %1188 = vmatpush1.msra.mxu0 %v3056_v22  ;;  %1259 = vmatpush1.msra.mxu1 %v3058_v23  ;;  %v4254_v22 = vld [vmem:[#allocation34_spill] sm:$0xff]  ;;  %v4255_v23 = vld [vmem:[#allocation35_spill] sm:$0xff] }
 0x25d   : > { %1189 = vmatprep.subr.mxu0 %v3062_v24  ;;  %1260 = vmatprep.subr.mxu1 %v3064_v25  ;;  %v4256_v24 = vld [vmem:[#allocation36_spill] sm:$0xff]  ;;  %v4257_v25 = vld [vmem:[#allocation37_spill] sm:$0xff] }
 0x25e   : > { %1190 = vmatpush1.msra.mxu0 %v3068_v26  ;;  %1261 = vmatpush1.msra.mxu1 %v3070_v27  ;;  %v4258_v26 = vld [vmem:[#allocation38_spill] sm:$0xff]  ;;  %v4259_v27 = vmov 0.0  }
 0x25f   : > { %1191 = vmatprep.subr.mxu0 %v3074_v28  ;;  %1262 = vmatprep.subr.mxu1 %v3076_v29  ;;  %v1420_v28 = vld [vmem:[#allocation7 + $0x1e8] sm:$0xff]  ;;  %v1422_v29 = vld [vmem:[#allocation7 + $0x1f8] sm:$0xff] }
 0x260   : > { %1192 = vmatpush1.msra.mxu0 %v3080_v30  ;;  %1263 = vmatpush1.msra.mxu1 %v3082_v31  ;;  %v4260_v31 = vld [vmem:[#allocation43_spill] sm:$0xff] }
 0x261   : > { %1193 = vmatprep.subr.mxu0 %v3086_v32  ;;  %1264 = vmatprep.subr.mxu1 %v3088_v33 }
 0x262   : > { %1194 = vmatpush1.msra.mxu0 %v3092_v34  ;;  %1265 = vmatpush1.msra.mxu1 %v3094_v35  ;;  %v4261_v35 = vld [vmem:[#allocation45_spill] sm:$0xff] }
 0x263   : > { %1195 = vmatprep.subr.mxu0 %v3098_v36  ;;  %1266 = vmatprep.subr.mxu1 %v3100_v37 }
 0x264   : > { %1196 = vmatpush1.msra.mxu0 %v3104_v38  ;;  %1267 = vmatpush1.msra.mxu1 %v3106_v39 }
 0x265   : > { %1197 = vmatprep.subr.mxu0 %v3110_v40  ;;  %1268 = vmatprep.subr.mxu1 %v3112_v41  ;;  %v4262_v40 = vld [vmem:[#allocation48_spill] sm:$0xff] }
 0x266   : > { %1198 = vmatpush1.msra.mxu0 %v3116_v42  ;;  %1269 = vmatpush1.msra.mxu1 %v3120_v43  ;;  %v4263_v42 = vld [vmem:[#allocation46_spill] sm:$0xff] }
 0x267   : > { %1199 = vmatprep.subr.mxu0 %v3125_v45  ;;  %1270 = vmatprep.subr.mxu1 %v3127_v46 }
 0x268   : > { %1200 = vmatpush1.msra.mxu0 %v3131_v47  ;;  %1271 = vmatpush1.msra.mxu1 %v3135_v48 }
 0x269   : > { %1201 = vmatprep.subr.mxu0 %v4211_v49  ;;  %1272 = vmatprep.subr.mxu1 %v4212_v54 }
 0x26a   : > { %1202 = vmatpush1.msra.mxu0 %v4213_v3  ;;  %1273 = vmatpush1.msra.mxu1 %v4214_v9 }
 0x26b   : > { %1203 = vmatprep.subr.mxu0 %v4215_v0  ;;  %1274 = vmatprep.subr.mxu1 %v4216_v57 }
 0x26c   : > { %1204 = vmatpush1.msra.mxu0 %v4217_v55  ;;  %1275 = vmatpush1.msra.mxu1 %v4242_v10  ;;  %v1409_v10 = vld [vmem:[#allocation7 + $0x190] sm:$0xff] }
 0x26d   : > { %1205 = vmatprep.subr.mxu0 %v4243_v11  ;;  %1276 = vmatprep.subr.mxu1 %v4244_v12  ;;  %v1404_v11 = vld [vmem:[#allocation7 + $0x168] sm:$0xff]  ;;  %v1406_v12 = vld [vmem:[#allocation7 + $0x178] sm:$0xff] }
 0x26e   : > { %1206 = vmatpush1.msra.mxu0 %v4245_v13  ;;  %1277 = vmatpush1.msra.mxu1 %v4246_v14  ;;  %v1403_v13 = vld [vmem:[#allocation7 + $0x160] sm:$0xff]  ;;  %v1405_v14 = vld [vmem:[#allocation7 + $0x170] sm:$0xff] }
 0x26f   : > { %1207 = vmatprep.subr.mxu0 %v4247_v15  ;;  %1278 = vmatprep.subr.mxu1 %v4248_v16  ;;  %v1400_v15 = vld [vmem:[#allocation7 + $0x148] sm:$0xff]  ;;  %v1402_v16 = vld [vmem:[#allocation7 + $0x158] sm:$0xff] }
 0x270   : > { %1208 = vmatpush1.msra.mxu0 %v4249_v17  ;;  %1279 = vmatpush1.msra.mxu1 %v4250_v18  ;;  %v1399_v17 = vld [vmem:[#allocation7 + $0x140] sm:$0xff]  ;;  %v1401_v18 = vld [vmem:[#allocation7 + $0x150] sm:$0xff] }
 0x271   : > { %1209 = vmatprep.subr.mxu0 %v4251_v19  ;;  %1280 = vmatprep.subr.mxu1 %v4252_v20  ;;  %v1396_v19 = vld [vmem:[#allocation7 + $0x128] sm:$0xff]  ;;  %v1398_v20 = vld [vmem:[#allocation7 + $0x138] sm:$0xff] }
 0x272   : > { %1210 = vmatpush1.msra.mxu0 %v4253_v21  ;;  %1281 = vmatpush1.msra.mxu1 %v4254_v22  ;;  %v1395_v21 = vld [vmem:[#allocation7 + $0x120] sm:$0xff]  ;;  %v1397_v22 = vld [vmem:[#allocation7 + $0x130] sm:$0xff] }
 0x273   : > { %1211 = vmatprep.subr.mxu0 %v4255_v23  ;;  %1282 = vmatprep.subr.mxu1 %v4256_v24  ;;  %v1392_v23 = vld [vmem:[#allocation7 + $0x108] sm:$0xff]  ;;  %v1394_v24 = vld [vmem:[#allocation7 + $0x118] sm:$0xff] }
 0x274   : > { %1212 = vmatpush1.msra.mxu0 %v4257_v25  ;;  %1283 = vmatpush1.msra.mxu1 %v4258_v26  ;;  %v1391_v25 = vld [vmem:[#allocation7 + $0x100] sm:$0xff]  ;;  %v1393_v26 = vld [vmem:[#allocation7 + $0x110] sm:$0xff] }
 0x275   : > { %1245 = vmatprep.mubr.f32.mxu0 %v4259_v27  ;;  %1316 = vmatprep.mubr.f32.mxu1 %v4259_v27 }
 0x276   : > { %1445 = vmatprep.subr.mxu0 %v1420_v28  ;;  %1534 = vmatprep.subr.mxu1 %v1422_v29  ;;  %v1388_v28 = vld [vmem:[#allocation7 + $0xe8] sm:$0xff]  ;;  %v1390_v29 = vld [vmem:[#allocation7 + $0xf8] sm:$0xff] }
 0x315   : > { %v1070_v30 = vpop.f32.mrf.mxu0  ;;  %v1141_v37 = vpop.f32.mrf.mxu1 }
 0x316   : > { %v1146_v32 = vadd.f32 %v1070_v30, %v4260_v31  ;;  %v1148_v43 = vadd.f32 %v1141_v37, %v4263_v42  ;;  %v1387_v30 = vld [vmem:[#allocation7 + $0xe0] sm:$0xff]  ;;  %v1389_v31 = vld [vmem:[#allocation7 + $0xf0] sm:$0xff]  ;;  %v1382_v37 = vld [vmem:[#allocation7 + $0xb8] sm:$0xff] }
 0x317   : > { %v1072_v33 = vpop.f32.mrf.mxu0  ;;  %v1143_v39 = vpop.f32.mrf.mxu1  ;;  %v1375_v42 = vld [vmem:[#allocation7 + $0x80] sm:$0xff] }
 0x318   : > { %v2584_v34 = vmul.f32 -1.442695, %v1146_v32  ;;  %v1147_v36 = vadd.f32 %v1072_v33, %v4261_v35  ;;  %v1149_v41 = vadd.f32 %v1143_v39, %v4262_v40  ;;  %v1384_v32 = vld [vmem:[#allocation7 + $0xc8] sm:$0xff]  ;;  %v1386_v33 = vld [vmem:[#allocation7 + $0xd8] sm:$0xff]  ;;  %v1385_v35 = vld [vmem:[#allocation7 + $0xd0] sm:$0xff] }
 0x319   : > { %v1381_v39 = vld [vmem:[#allocation7 + $0xb0] sm:$0xff]  ;;  %v1376_v40 = vld [vmem:[#allocation7 + $0x88] sm:$0xff] }
 0x31a   : > { %2727 = vpow2.f32 %v2584_v34  ;;  %v2585_v38 = vmul.f32 -1.442695, %v1147_v36  ;;  %v2586_v45 = vmul.f32 -1.442695, %v1149_v41  ;;  %v1383_v34 = vld [vmem:[#allocation7 + $0xc0] sm:$0xff]  ;;  %v1380_v36 = vld [vmem:[#allocation7 + $0xa8] sm:$0xff] }
 0x31b   : > { %v1378_v41 = vld [vmem:[#allocation7 + $0x98] sm:$0xff] }
 0x31c   : > { %2729 = vpow2.f32 %v2585_v38  ;;  %v1379_v38 = vld [vmem:[#allocation7 + $0xa0] sm:$0xff] }
 0x31d   : > { %2731 = vtanh.f32 %v1148_v43  ;;  %v1377_v43 = vld [vmem:[#allocation7 + $0x90] sm:$0xff] }
 0x31e   : > { %2733 = vpow2.f32 %v2586_v45  ;;  %v1372_v45 = vld [vmem:[#allocation7 + $0x68] sm:$0xff] }
 0x327   : > { %v2728_v46 = vpop.eup %2727 }
 0x328   : > { %v1153_v47 = vadd.f32 1.0, %v2728_v46  ;;  %v1374_v46 = vld [vmem:[#allocation7 + $0x78] sm:$0xff] }
 0x329   : > { %v2730_v48 = vpop.eup %2729 }
 0x32a   : > { %2735 = vrcp.f32 %v1153_v47  ;;  %v1159_v60 = vadd.f32 1.0, %v2730_v48  ;;  %v2732_v49 = vpop.eup %2731  ;;  %v1371_v47 = vld [vmem:[#allocation7 + $0x60] sm:$0xff]  ;;  %v1373_v48 = vld [vmem:[#allocation7 + $0x70] sm:$0xff] }
 0x32b   : > { %v2734_v54 = vpop.eup %2733 }
 0x32c   : > { %2737 = vrcp.f32 %v1159_v60  ;;  %v1166_v57 = vadd.f32 1.0, %v2734_v54  ;;  %v1368_v60 = vld [vmem:[#allocation7 + $0x48] sm:$0xff]  ;;  %v1367_v54 = vld [vmem:[#allocation7 + $0x40] sm:$0xff] }
 0x32e   : > { %2739 = vrcp.f32 %v1166_v57  ;;  %v1363_v57 = vld [vmem:[#allocation7 + $0x20] sm:$0xff] }
 0x337   : > { %v2736_v3 = vpop.eup %2735 }
 0x338   : > { %v1170_v9 = vmul.f32 %v2736_v3, %v2732_v49  ;;  %v1370_v49 = vld [vmem:[#allocation7 + $0x58] sm:$0xff]  ;;  %v1369_v3 = vld [vmem:[#allocation7 + $0x50] sm:$0xff] }
 0x339   : > { %v2738_v0 = vpop.eup %2737 }
 0x33a   : > { %v1169_v55 = vmul.f32 %v2738_v0, %v3414_v59  ;;  %v1408_v59 = vld [vmem:[#allocation7 + $0x188] sm:$0xff]  ;;  %v1366_v0 = vld [vmem:[#allocation7 + $0x38] sm:$0xff] }
 0x33b   : > { %v2740_v63 = vpop.eup %2739 }
 0x33c   : > { %v3490_v52 = vadd.f32 %v1170_v9, %v1169_v55  ;;  %v1364_v9 = vld [vmem:[#allocation7 + $0x28] sm:$0xff]  ;;  %v1365_v55 = vld [vmem:[#allocation7 + $0x30] sm:$0xff] }
 0x33e   : > { %2741 = vtanh.f32 %v3490_v52 }
 0x34b   : > { %v2742_v44 = vpop.eup %2741 }
 0x34c   : > { %v3493_v5 = vmul.f32 %v2742_v44, %v2740_v63  ;;  %v1360_v63 = vld [vmem:[#allocation7 + $0x8] sm:$0xff]  ;;  %v1362_v44 = vld [vmem:[#allocation7 + $0x18] sm:$0xff] }
 0x34e   : > { %1246 = vmatmul.mubr.f32.vlgmr.msra.gmra.mxu0 %v3493_v5  ;;  %1317 = vmatmul.mubr.f32.vlgmr.msra.gmra.mxu1 %v3493_v5 }
 0x34f   : > { %1446 = vmatpush1.msra.mxu0 %v1419_v51  ;;  %1535 = vmatpush1.msra.mxu1 %v1421_v58  ;;  %v1359_v51 = vld [vmem:[#allocation7] sm:$0xff]  ;;  %v1361_v58 = vld [vmem:[#allocation7 + $0x10] sm:$0xff] }
 0x350   : > { %1447 = vmatprep.subr.mxu0 %v1416_v2  ;;  %1536 = vmatprep.subr.mxu1 %v1418_v1  ;;  %v4264_v2 = vld [vmem:[#allocation52_spill] sm:$0xff]  ;;  %v3511_v1 = vld [vmem:[#allocation9 + $0x3e8] sm:$0xff] }
 0x351   : > { %1448 = vmatpush1.msra.mxu0 %v1415_v50  ;;  %1537 = vmatpush1.msra.mxu1 %v1417_v6  ;;  %4265 = vst [vmem:[#allocation15_spill] sm:$0xff] %v3511_v1  ;;  %v3513_v50 = vld [vmem:[#allocation9 + $0x3f8] sm:$0xff]  ;;  %v3519_v6 = vld [vmem:[#allocation9 + $0x3f0] sm:$0xff] }
 0x352   : > { %1449 = vmatprep.subr.mxu0 %v1412_v7  ;;  %1538 = vmatprep.subr.mxu1 %v1414_v56  ;;  %4266 = vst [vmem:[#allocation16_spill] sm:$0xff] %v3513_v50  ;;  %v3525_v7 = vld [vmem:[#allocation9 + $0x3d8] sm:$0xff]  ;;  %v3529_v56 = vld [vmem:[#allocation9 + $0x3c0] sm:$0xff] }
 0x353   : > { %1450 = vmatpush1.msra.mxu0 %v1411_v4  ;;  %1539 = vmatpush1.msra.mxu1 %v1413_v61  ;;  %v3531_v4 = vld [vmem:[#allocation9 + $0x3d0] sm:$0xff]  ;;  %v3535_v61 = vld [vmem:[#allocation9 + $0x3a8] sm:$0xff] }
 0x354   : > { %1451 = vmatprep.subr.mxu0 %v1408_v59  ;;  %1540 = vmatprep.subr.mxu1 %v1410_v53  ;;  %v3537_v59 = vld [vmem:[#allocation9 + $0x3b8] sm:$0xff]  ;;  %v3541_v53 = vld [vmem:[#allocation9 + $0x3a0] sm:$0xff] }
 0x355   : > { %1452 = vmatpush1.msra.mxu0 %v1407_v8  ;;  %1541 = vmatpush1.msra.mxu1 %v1409_v10  ;;  %v3543_v8 = vld [vmem:[#allocation9 + $0x3b0] sm:$0xff]  ;;  %v3547_v10 = vld [vmem:[#allocation9 + $0x388] sm:$0xff] }
 0x356   : > { %1453 = vmatprep.subr.mxu0 %v1404_v11  ;;  %1542 = vmatprep.subr.mxu1 %v1406_v12  ;;  %v3549_v11 = vld [vmem:[#allocation9 + $0x398] sm:$0xff]  ;;  %v3553_v12 = vld [vmem:[#allocation9 + $0x380] sm:$0xff] }
 0x357   : > { %1454 = vmatpush1.msra.mxu0 %v1403_v13  ;;  %1543 = vmatpush1.msra.mxu1 %v1405_v14  ;;  %v3555_v13 = vld [vmem:[#allocation9 + $0x390] sm:$0xff]  ;;  %v3559_v14 = vld [vmem:[#allocation9 + $0x368] sm:$0xff] }
 0x358   : > { %1455 = vmatprep.subr.mxu0 %v1400_v15  ;;  %1544 = vmatprep.subr.mxu1 %v1402_v16  ;;  %v3561_v15 = vld [vmem:[#allocation9 + $0x378] sm:$0xff]  ;;  %v3565_v16 = vld [vmem:[#allocation9 + $0x360] sm:$0xff] }
 0x359   : > { %1456 = vmatpush1.msra.mxu0 %v1399_v17  ;;  %1545 = vmatpush1.msra.mxu1 %v1401_v18  ;;  %v3567_v17 = vld [vmem:[#allocation9 + $0x370] sm:$0xff]  ;;  %v3571_v18 = vld [vmem:[#allocation9 + $0x348] sm:$0xff] }
 0x35a   : > { %1457 = vmatprep.subr.mxu0 %v1396_v19  ;;  %1546 = vmatprep.subr.mxu1 %v1398_v20  ;;  %v3573_v19 = vld [vmem:[#allocation9 + $0x358] sm:$0xff]  ;;  %v3577_v20 = vld [vmem:[#allocation9 + $0x340] sm:$0xff] }
 0x35b   : > { %1458 = vmatpush1.msra.mxu0 %v1395_v21  ;;  %1547 = vmatpush1.msra.mxu1 %v1397_v22  ;;  %v3579_v21 = vld [vmem:[#allocation9 + $0x350] sm:$0xff]  ;;  %v3583_v22 = vld [vmem:[#allocation9 + $0x328] sm:$0xff] }
 0x35c   : > { %1459 = vmatprep.subr.mxu0 %v1392_v23  ;;  %1548 = vmatprep.subr.mxu1 %v1394_v24  ;;  %v3585_v23 = vld [vmem:[#allocation9 + $0x338] sm:$0xff]  ;;  %v3589_v24 = vld [vmem:[#allocation9 + $0x320] sm:$0xff] }
 0x35d   : > { %1460 = vmatpush1.msra.mxu0 %v1391_v25  ;;  %1549 = vmatpush1.msra.mxu1 %v1393_v26  ;;  %v3591_v25 = vld [vmem:[#allocation9 + $0x330] sm:$0xff]  ;;  %v3595_v26 = vld [vmem:[#allocation9 + $0x308] sm:$0xff] }
 0x35e   : > { %1461 = vmatprep.subr.mxu0 %v1388_v28  ;;  %1550 = vmatprep.subr.mxu1 %v1390_v29  ;;  %v3597_v28 = vld [vmem:[#allocation9 + $0x318] sm:$0xff]  ;;  %v3599_v29 = vld [vmem:[#allocation9 + $0x300] sm:$0xff] }
 0x35f   : > { %1462 = vmatpush1.msra.mxu0 %v1387_v30  ;;  %1551 = vmatpush1.msra.mxu1 %v1389_v31  ;;  %v3603_v30 = vld [vmem:[#allocation9 + $0x310] sm:$0xff]  ;;  %v3605_v31 = vld [vmem:[#allocation9 + $0x2e8] sm:$0xff] }
 0x360   : > { %1463 = vmatprep.subr.mxu0 %v1384_v32  ;;  %1552 = vmatprep.subr.mxu1 %v1386_v33  ;;  %v3607_v32 = vld [vmem:[#allocation9 + $0x2f8] sm:$0xff]  ;;  %v3611_v33 = vld [vmem:[#allocation9 + $0x2e0] sm:$0xff] }
 0x361   : > { %1464 = vmatpush1.msra.mxu0 %v1383_v34  ;;  %1553 = vmatpush1.msra.mxu1 %v1385_v35  ;;  %v3613_v34 = vld [vmem:[#allocation9 + $0x2f0] sm:$0xff]  ;;  %v3615_v35 = vld [vmem:[#allocation9 + $0x2c8] sm:$0xff] }
 0x362   : > { %1465 = vmatprep.subr.mxu0 %v1380_v36  ;;  %1554 = vmatprep.subr.mxu1 %v1382_v37  ;;  %v3619_v36 = vld [vmem:[#allocation9 + $0x2d8] sm:$0xff]  ;;  %v3621_v37 = vld [vmem:[#allocation9 + $0x2c0] sm:$0xff] }
 0x363   : > { %1466 = vmatpush1.msra.mxu0 %v1379_v38  ;;  %1555 = vmatpush1.msra.mxu1 %v1381_v39  ;;  %v3623_v38 = vld [vmem:[#allocation9 + $0x2d0] sm:$0xff]  ;;  %v3627_v39 = vld [vmem:[#allocation9 + $0x2a8] sm:$0xff] }
 0x364   : > { %1467 = vmatprep.subr.mxu0 %v1376_v40  ;;  %1556 = vmatprep.subr.mxu1 %v1378_v41  ;;  %v3629_v40 = vld [vmem:[#allocation9 + $0x2b8] sm:$0xff]  ;;  %v3633_v41 = vld [vmem:[#allocation9 + $0x2a0] sm:$0xff] }
 0x365   : > { %1468 = vmatpush1.msra.mxu0 %v1375_v42  ;;  %1557 = vmatpush1.msra.mxu1 %v1377_v43  ;;  %v3635_v42 = vld [vmem:[#allocation9 + $0x2b0] sm:$0xff]  ;;  %v3639_v43 = vld [vmem:[#allocation9 + $0x288] sm:$0xff] }
 0x366   : > { %1469 = vmatprep.subr.mxu0 %v1372_v45  ;;  %1558 = vmatprep.subr.mxu1 %v1374_v46  ;;  %4267 = vst [vmem:[#allocation17_spill] sm:$0xff] %v3635_v42  ;;  %4268 = vst [vmem:[#allocation18_spill] sm:$0xff] %v3639_v43  ;;  %v3641_v45 = vld [vmem:[#allocation9 + $0x298] sm:$0xff]  ;;  %v3645_v46 = vld [vmem:[#allocation9 + $0x280] sm:$0xff] }
 0x367   : > { %1470 = vmatpush1.msra.mxu0 %v1371_v47  ;;  %1559 = vmatpush1.msra.mxu1 %v1373_v48  ;;  %4269 = vst [vmem:[#allocation19_spill] sm:$0xff] %v3641_v45  ;;  %4270 = vst [vmem:[#allocation20_spill] sm:$0xff] %v3645_v46  ;;  %v3647_v47 = vld [vmem:[#allocation9 + $0x290] sm:$0xff]  ;;  %v3651_v48 = vld [vmem:[#allocation9 + $0x268] sm:$0xff] }
 0x368   : > { %1471 = vmatprep.subr.mxu0 %v1368_v60  ;;  %1560 = vmatprep.subr.mxu1 %v1370_v49  ;;  %4271 = vst [vmem:[#allocation21_spill] sm:$0xff] %v3647_v47  ;;  %4272 = vst [vmem:[#allocation13_spill] sm:$0xff] %v3651_v48  ;;  %v3653_v60 = vld [vmem:[#allocation9 + $0x278] sm:$0xff]  ;;  %v3657_v49 = vld [vmem:[#allocation9 + $0x260] sm:$0xff] }
 0x369   : > { %1472 = vmatpush1.msra.mxu0 %v1367_v54  ;;  %1561 = vmatpush1.msra.mxu1 %v1369_v3  ;;  %4273 = vst [vmem:[#allocation14_spill] sm:$0xff] %v3653_v60  ;;  %4274 = vst [vmem:[#allocation40_spill] sm:$0xff] %v3657_v49  ;;  %v3659_v54 = vld [vmem:[#allocation9 + $0x270] sm:$0xff]  ;;  %v3663_v3 = vld [vmem:[#allocation9 + $0x248] sm:$0xff] }
 0x36a   : > { %1473 = vmatprep.subr.mxu0 %v1364_v9  ;;  %1562 = vmatprep.subr.mxu1 %v1366_v0  ;;  %4275 = vst [vmem:[#allocation41_spill] sm:$0xff] %v3659_v54  ;;  %4276 = vst [vmem:[#allocation44_spill] sm:$0xff] %v3663_v3  ;;  %v3665_v9 = vld [vmem:[#allocation9 + $0x258] sm:$0xff]  ;;  %v3669_v0 = vld [vmem:[#allocation9 + $0x240] sm:$0xff] }
 0x36b   : > { %1474 = vmatpush1.msra.mxu0 %v1363_v57  ;;  %1563 = vmatpush1.msra.mxu1 %v1365_v55  ;;  %4277 = vst [vmem:[#allocation42_spill] sm:$0xff] %v3665_v9  ;;  %4278 = vst [vmem:[#allocation22_spill] sm:$0xff] %v3669_v0  ;;  %v3671_v57 = vld [vmem:[#allocation9 + $0x250] sm:$0xff]  ;;  %v3677_v55 = vld [vmem:[#allocation9 + $0x228] sm:$0xff] }
 0x36c   : > { %1475 = vmatprep.subr.mxu0 %v1360_v63  ;;  %1564 = vmatprep.subr.mxu1 %v1362_v44  ;;  %4279 = vst [vmem:[#allocation23_spill] sm:$0xff] %v3671_v57  ;;  %4280 = vst [vmem:[#allocation24_spill] sm:$0xff] %v3677_v55  ;;  %v3679_v63 = vld [vmem:[#allocation9 + $0x238] sm:$0xff]  ;;  %v3681_v44 = vld [vmem:[#allocation9 + $0x220] sm:$0xff] }
 0x36d   : > { %1476 = vmatpush1.msra.mxu0 %v1359_v51  ;;  %1509 = vmatprep.mubr.f32.mxu0 %v4259_v27  ;;  %4281 = vst [vmem:[#allocation25_spill] sm:$0xff] %v3679_v63  ;;  %4282 = vst [vmem:[#allocation26_spill] sm:$0xff] %v3681_v44  ;;  %v3685_v51 = vld [vmem:[#allocation9 + $0x230] sm:$0xff] }
 0x36e   : > { %1565 = vmatpush1.msra.mxu1 %v1361_v58  ;;  %1598 = vmatprep.mubr.f32.mxu1 %v4259_v27  ;;  %4283 = vst [vmem:[#allocation27_spill] sm:$0xff] %v3685_v51  ;;  %v3687_v58 = vld [vmem:[#allocation9 + $0x208] sm:$0xff] }
 0x36f   : > { %1510 = vmatmul.mubr.f32.vlgmr.msra.gmra.mxu0 %v4264_v2  ;;  %1599 = vmatmul.mubr.f32.vlgmr.msra.gmra.mxu1 %v4264_v2  ;;  %4284 = vst [vmem:[#allocation28_spill] sm:$0xff] %v3687_v58  ;;  %v3689_v2 = vld [vmem:[#allocation9 + $0x218] sm:$0xff] }
 0x370   : > { %1515 = vmatprep.mubr.f32.mxu0 %v4259_v27  ;;  %1604 = vmatprep.mubr.f32.mxu1 %v4259_v27  ;;  %4285 = vst [vmem:[#allocation29_spill] sm:$0xff] %v3689_v2 }
 0x371   : > { %1712 = vmatprep.subr.mxu0 %v3511_v1  ;;  %1783 = vmatprep.subr.mxu1 %v3513_v50 }
 0x372   : > { %1784 = vmatpush1.msra.mxu1 %v3519_v6 }
 0x373   : > { %1516 = vmatmul.mubr.f32.gmra.mxu0 %v3417_v62  ;;  %1605 = vmatmul.mubr.f32.gmra.mxu1 %v3417_v62  ;;  %v3517_v62 = vld [vmem:[#allocation9 + $0x3e0] sm:$0xff] }
 0x374   : > { %1521 = vmatprep.mubr.f32.mxu0 %v4259_v27  ;;  %1610 = vmatprep.mubr.f32.mxu1 %v4259_v27 }
 0x375   : > { %1713 = vmatpush1.msra.mxu0 %v3517_v62  ;;  %1785 = vmatprep.subr.mxu1 %v3525_v7 }
 0x376   : > { %1786 = vmatpush1.msra.mxu1 %v3531_v4 }
 0x377   : > { %1522 = vmatmul.mubr.f32.gmra.mxu0 %v3493_v5  ;;  %1611 = vmatmul.mubr.f32.gmra.mxu1 %v3493_v5  ;;  %v3523_v5 = vld [vmem:[#allocation9 + $0x3c8] sm:$0xff] }
 0x378   : > { %1527 = vmatprep.mubr.f32.mxu0 %v4259_v27  ;;  %1616 = vmatprep.mubr.f32.mxu1 %v4259_v27 }
 0x379   : > { %1714 = vmatprep.subr.mxu0 %v3523_v5  ;;  %1787 = vmatprep.subr.mxu1 %v3537_v59 }
 0x37a   : > { %1715 = vmatpush1.msra.mxu0 %v3529_v56  ;;  %1788 = vmatpush1.msra.mxu1 %v3543_v8 }
 0x37b   : > { %1716 = vmatprep.subr.mxu0 %v3535_v61  ;;  %1789 = vmatprep.subr.mxu1 %v3549_v11 }
 0x37c   : > { %1717 = vmatpush1.msra.mxu0 %v3541_v53  ;;  %1790 = vmatpush1.msra.mxu1 %v3555_v13 }
 0x37d   : > { %1718 = vmatprep.subr.mxu0 %v3547_v10  ;;  %1791 = vmatprep.subr.mxu1 %v3561_v15 }
 0x37e   : > { %1719 = vmatpush1.msra.mxu0 %v3553_v12  ;;  %1792 = vmatpush1.msra.mxu1 %v3567_v17 }
 0x37f   : > { %1720 = vmatprep.subr.mxu0 %v3559_v14  ;;  %1793 = vmatprep.subr.mxu1 %v3573_v19 }
 0x380   : > { %1721 = vmatpush1.msra.mxu0 %v3565_v16  ;;  %1794 = vmatpush1.msra.mxu1 %v3579_v21 }
 0x381   : > { %1722 = vmatprep.subr.mxu0 %v3571_v18  ;;  %1795 = vmatprep.subr.mxu1 %v3585_v23 }
 0x382   : > { %1723 = vmatpush1.msra.mxu0 %v3577_v20  ;;  %1796 = vmatpush1.msra.mxu1 %v3591_v25 }
 0x383   : > { %1724 = vmatprep.subr.mxu0 %v3583_v22  ;;  %1797 = vmatprep.subr.mxu1 %v3597_v28 }
 0x384   : > { %1725 = vmatpush1.msra.mxu0 %v3589_v24  ;;  %1798 = vmatpush1.msra.mxu1 %v3603_v30 }
 0x385   : > { %1726 = vmatprep.subr.mxu0 %v3595_v26  ;;  %1799 = vmatprep.subr.mxu1 %v3607_v32 }
 0x386   : > { %1727 = vmatpush1.msra.mxu0 %v3599_v29  ;;  %1800 = vmatpush1.msra.mxu1 %v3613_v34 }
 0x387   : > { %1728 = vmatprep.subr.mxu0 %v3605_v31  ;;  %1801 = vmatprep.subr.mxu1 %v3619_v36 }
 0x388   : > { %1729 = vmatpush1.msra.mxu0 %v3611_v33  ;;  %1802 = vmatpush1.msra.mxu1 %v3623_v38 }
 0x389   : > { %1730 = vmatprep.subr.mxu0 %v3615_v35  ;;  %1803 = vmatprep.subr.mxu1 %v3629_v40 }
 0x38a   : > { %1731 = vmatpush1.msra.mxu0 %v3621_v37  ;;  %1804 = vmatpush1.msra.mxu1 %v3635_v42 }
 0x38b   : > { %1732 = vmatprep.subr.mxu0 %v3627_v39  ;;  %1805 = vmatprep.subr.mxu1 %v3641_v45 }
 0x38c   : > { %1733 = vmatpush1.msra.mxu0 %v3633_v41  ;;  %1806 = vmatpush1.msra.mxu1 %v3647_v47 }
 0x38d   : > { %1734 = vmatprep.subr.mxu0 %v3639_v43  ;;  %1807 = vmatprep.subr.mxu1 %v3653_v60  ;;  %v4290_v60 = vld [vmem:[#allocation51_spill] sm:$0xff] }
 0x38e   : > { %1735 = vmatpush1.msra.mxu0 %v3645_v46  ;;  %1808 = vmatpush1.msra.mxu1 %v3659_v54 }
 0x38f   : > { %1736 = vmatprep.subr.mxu0 %v3651_v48  ;;  %1809 = vmatprep.subr.mxu1 %v3665_v9  ;;  %v3693_v9 = vld [vmem:[#allocation9 + $0x200] sm:$0xff]  ;;  %v4291_v48 = vld [vmem:[#allocation50_spill] sm:$0xff] }
 0x390   : > { %1737 = vmatpush1.msra.mxu0 %v3657_v49  ;;  %1810 = vmatpush1.msra.mxu1 %v3671_v57  ;;  %4286 = vst [vmem:[#allocation30_spill] sm:$0xff] %v3693_v9 }
 0x391   : > { %1738 = vmatprep.subr.mxu0 %v3663_v3  ;;  %1811 = vmatprep.subr.mxu1 %v3679_v63  ;;  %v3695_v3 = vld [vmem:[#allocation9 + $0x210] sm:$0xff] }
 0x392   : > { %1739 = vmatpush1.msra.mxu0 %v3669_v0  ;;  %4287 = vst [vmem:[#allocation31_spill] sm:$0xff] %v3695_v3  ;;  %1812 = vmatpush1.msra.mxu1 %v3685_v51 }
 0x393   : > { %1740 = vmatprep.subr.mxu0 %v3677_v55  ;;  %1813 = vmatprep.subr.mxu1 %v3689_v2  ;;  %v4288_v55 = vld [vmem:[#allocation47_spill] sm:$0xff] }
 0x394   : > { %1741 = vmatpush1.msra.mxu0 %v3681_v44  ;;  %1814 = vmatpush1.msra.mxu1 %v3695_v3  ;;  %v4289_v44 = vld [vmem:[#allocation49_spill] sm:$0xff] }
 0x395   : > { %1742 = vmatprep.subr.mxu0 %v3687_v58  ;;  %1957 = vmatprep.subr.mxu1 %v3513_v50 }
 0x396   : > { %1743 = vmatpush1.msra.mxu0 %v3693_v9 }
 0x397   : > { %1886 = vmatprep.subr.mxu0 %v3511_v1 }
 0x40e   : > { %v1247_v63 = vpop.f32.mrf.mxu0  ;;  %v1318_v51 = vpop.f32.mrf.mxu1 }
 0x40f   : > { %v1323_v57 = vadd.f32 %v1247_v63, %v4288_v55  ;;  %v1325_v3 = vadd.f32 %v1318_v51, %v4291_v48  ;;  %v4296_v51 = vld [vmem:[#allocation40_spill] sm:$0xff] }
 0x410   : > { %v1249_v0 = vpop.f32.mrf.mxu0  ;;  %v1320_v2 = vpop.f32.mrf.mxu1 }
 0x411   : > { %v2587_v54 = vmul.f32 -1.442695, %v1323_v57  ;;  %v1324_v49 = vadd.f32 %v1249_v0, %v4289_v44  ;;  %v1326_v9 = vadd.f32 %v1320_v2, %v4290_v60  ;;  %v4297_v2 = vld [vmem:[#allocation41_spill] sm:$0xff] }
 0x413   : > { %2743 = vpow2.f32 %v2587_v54  ;;  %v2588_v58 = vmul.f32 -1.442695, %v1324_v49  ;;  %v2589_v47 = vmul.f32 -1.442695, %v1326_v9  ;;  %v4295_v9 = vld [vmem:[#allocation14_spill] sm:$0xff] }
 0x415   : > { %2745 = vpow2.f32 %v2588_v58 }
 0x416   : > { %2747 = vtanh.f32 %v1325_v3 }
 0x417   : > { %2749 = vpow2.f32 %v2589_v47  ;;  %v4294_v47 = vld [vmem:[#allocation13_spill] sm:$0xff] }
 0x420   : > { %v2744_v1 = vpop.eup %2743 }
 0x421   : > { %v1330_v46 = vadd.f32 1.0, %v2744_v1 }
 0x422   : > { %v2746_v50 = vpop.eup %2745 }
 0x423   : > { %2751 = vrcp.f32 %v1330_v46  ;;  %v1336_v55 = vadd.f32 1.0, %v2746_v50  ;;  %v2748_v57 = vpop.eup %2747  ;;  %v1705_v50 = vld [vmem:[#allocation4 + $0x8] sm:$0xff] }
 0x424   : > { %v2750_v0 = vpop.eup %2749  ;;  %v4293_v46 = vld [vmem:[#allocation21_spill] sm:$0xff] }
 0x425   : > { %2753 = vrcp.f32 %v1336_v55  ;;  %v1343_v44 = vadd.f32 1.0, %v2750_v0  ;;  %v4298_v55 = vld [vmem:[#allocation44_spill] sm:$0xff]  ;;  %v4300_v0 = vld [vmem:[#allocation22_spill] sm:$0xff] }
 0x427   : > { %2755 = vrcp.f32 %v1343_v44  ;;  %v4304_v44 = vld [vmem:[#allocation26_spill] sm:$0xff] }
 0x430   : > { %v2752_v54 = vpop.eup %2751 }
 0x431   : > { %v1347_v63 = vmul.f32 %v2752_v54, %v2748_v57  ;;  %v4299_v57 = vld [vmem:[#allocation42_spill] sm:$0xff]  ;;  %v4301_v54 = vld [vmem:[#allocation23_spill] sm:$0xff] }
 0x432   : > { %v2754_v49 = vpop.eup %2753 }
 0x433   : > { %v1346_v58 = vmul.f32 %v2754_v49, %v3490_v52  ;;  %v4292_v52 = vld [vmem:[#allocation20_spill] sm:$0xff]  ;;  %v4303_v49 = vld [vmem:[#allocation25_spill] sm:$0xff] }
 0x434   : > { %v2756_v48 = vpop.eup %2755 }
 0x435   : > { %v1348_v60 = vadd.f32 %v1347_v63, %v1346_v58  ;;  %v4302_v63 = vld [vmem:[#allocation24_spill] sm:$0xff]  ;;  %v4305_v58 = vld [vmem:[#allocation27_spill] sm:$0xff] }
 0x437   : > { %2757 = vtanh.f32 %v1348_v60  ;;  %1354 = vst [vmem:[#allocation5 + $0x8] sm:$0xff] %v1348_v60  ;;  %v4306_v60 = vld [vmem:[#allocation28_spill] sm:$0xff] }
 0x444   : > { %v2758_v1 = vpop.eup %2757 }
 0x445   : > { %v1350_v3 = vmul.f32 %v2758_v1, %v2756_v48  ;;  %v4307_v48 = vld [vmem:[#allocation29_spill] sm:$0xff]  ;;  %v4308_v1 = vld [vmem:[#allocation30_spill] sm:$0xff] }
 0x447   : > { %1353 = vst [vmem:[#allocation4] sm:$0xff] %v1350_v3  ;;  %1528 = vmatmul.mubr.f32.gmra.mxu0 %v1350_v3  ;;  %1617 = vmatmul.mubr.f32.gmra.mxu1 %v1350_v3  ;;  %v4309_v3 = vld [vmem:[#allocation31_spill] sm:$0xff] }
 0x448   : > { %1776 = vmatprep.mubr.f32.mxu0 %v4259_v27  ;;  %1847 = vmatprep.mubr.f32.mxu1 %v4259_v27 }
 0x44b   : > { %1777 = vmatmul.mubr.f32.vlgmr.msra.gmra.mxu0 %v1705_v50  ;;  %1848 = vmatmul.mubr.f32.vlgmr.msra.gmra.mxu1 %v1705_v50  ;;  %v4310_v50 = vld [vmem:[#allocation15_spill] sm:$0xff] }
 0x44c   : > { %1887 = vmatpush1.msra.mxu0 %v3517_v62  ;;  %1958 = vmatpush1.msra.mxu1 %v3519_v6 }
 0x44d   : > { %1888 = vmatprep.subr.mxu0 %v3523_v5  ;;  %1959 = vmatprep.subr.mxu1 %v3525_v7 }
 0x44e   : > { %1889 = vmatpush1.msra.mxu0 %v3529_v56  ;;  %1960 = vmatpush1.msra.mxu1 %v3531_v4 }
 0x44f   : > { %1890 = vmatprep.subr.mxu0 %v3535_v61  ;;  %1961 = vmatprep.subr.mxu1 %v3537_v59 }
 0x450   : > { %1891 = vmatpush1.msra.mxu0 %v3541_v53  ;;  %1962 = vmatpush1.msra.mxu1 %v3543_v8 }
 0x451   : > { %1892 = vmatprep.subr.mxu0 %v3547_v10  ;;  %1963 = vmatprep.subr.mxu1 %v3549_v11 }
 0x452   : > { %1893 = vmatpush1.msra.mxu0 %v3553_v12  ;;  %1964 = vmatpush1.msra.mxu1 %v3555_v13 }
 0x453   : > { %1894 = vmatprep.subr.mxu0 %v3559_v14  ;;  %1965 = vmatprep.subr.mxu1 %v3561_v15 }
 0x454   : > { %1895 = vmatpush1.msra.mxu0 %v3565_v16  ;;  %1966 = vmatpush1.msra.mxu1 %v3567_v17 }
 0x455   : > { %1896 = vmatprep.subr.mxu0 %v3571_v18  ;;  %1967 = vmatprep.subr.mxu1 %v3573_v19 }
 0x456   : > { %1897 = vmatpush1.msra.mxu0 %v3577_v20  ;;  %1968 = vmatpush1.msra.mxu1 %v3579_v21 }
 0x457   : > { %1898 = vmatprep.subr.mxu0 %v3583_v22  ;;  %1969 = vmatprep.subr.mxu1 %v3585_v23 }
 0x458   : > { %1899 = vmatpush1.msra.mxu0 %v3589_v24  ;;  %1970 = vmatpush1.msra.mxu1 %v3591_v25 }
 0x459   : > { %1900 = vmatprep.subr.mxu0 %v3595_v26  ;;  %1971 = vmatprep.subr.mxu1 %v3597_v28 }
 0x45a   : > { %1901 = vmatpush1.msra.mxu0 %v3599_v29  ;;  %1972 = vmatpush1.msra.mxu1 %v3603_v30 }
 0x45b   : > { %1902 = vmatprep.subr.mxu0 %v3605_v31  ;;  %1973 = vmatprep.subr.mxu1 %v3607_v32 }
 0x45c   : > { %1903 = vmatpush1.msra.mxu0 %v3611_v33  ;;  %1974 = vmatpush1.msra.mxu1 %v3613_v34 }
 0x45d   : > { %1904 = vmatprep.subr.mxu0 %v3615_v35  ;;  %1975 = vmatprep.subr.mxu1 %v3619_v36 }
 0x45e   : > { %1905 = vmatpush1.msra.mxu0 %v3621_v37  ;;  %1976 = vmatpush1.msra.mxu1 %v3623_v38 }
 0x45f   : > { %1906 = vmatprep.subr.mxu0 %v3627_v39  ;;  %1977 = vmatprep.subr.mxu1 %v3629_v40 }
 0x460   : > { %1907 = vmatpush1.msra.mxu0 %v3633_v41  ;;  %1978 = vmatpush1.msra.mxu1 %v3635_v42 }
 0x461   : > { %1908 = vmatprep.subr.mxu0 %v3639_v43  ;;  %1979 = vmatprep.subr.mxu1 %v3641_v45 }
 0x462   : > { %1909 = vmatpush1.msra.mxu0 %v4292_v52  ;;  %1980 = vmatpush1.msra.mxu1 %v4293_v46 }
 0x463   : > { %1910 = vmatprep.subr.mxu0 %v4294_v47  ;;  %1981 = vmatprep.subr.mxu1 %v4295_v9 }
 0x464   : > { %1911 = vmatpush1.msra.mxu0 %v4296_v51  ;;  %1982 = vmatpush1.msra.mxu1 %v4297_v2 }
 0x465   : > { %1912 = vmatprep.subr.mxu0 %v4298_v55  ;;  %1983 = vmatprep.subr.mxu1 %v4299_v57 }
 0x466   : > { %1913 = vmatpush1.msra.mxu0 %v4300_v0  ;;  %1984 = vmatpush1.msra.mxu1 %v4301_v54 }
 0x467   : > { %1914 = vmatprep.subr.mxu0 %v4302_v63  ;;  %1985 = vmatprep.subr.mxu1 %v4303_v49  ;;  %v4311_v63 = vld [vmem:[#allocation16_spill] sm:$0xff]  ;;  %v1511_v49 = vpop.f32.mrf.mxu0 }
 0x468   : > { %1915 = vmatpush1.msra.mxu0 %v4304_v44  ;;  %1986 = vmatpush1.msra.mxu1 %v4305_v58  ;;  %v1600_v44 = vpop.f32.mrf.mxu1 }
 0x469   : > { %1916 = vmatprep.subr.mxu0 %v4306_v60  ;;  %1987 = vmatprep.subr.mxu1 %v4307_v48  ;;  %v1513_v54 = vpop.f32.mrf.mxu0 }
 0x46a   : > { %1917 = vmatpush1.msra.mxu0 %v4308_v1  ;;  %1950 = vmatprep.mubr.f32.mxu0 %v4259_v27  ;;  %v1602_v58 = vpop.f32.mrf.mxu1 }
 0x46b   : > { %1988 = vmatpush1.msra.mxu1 %v4309_v3  ;;  %2021 = vmatprep.mubr.f32.mxu1 %v4259_v27  ;;  %v3778_v0 = vpop.f32.mrf.mxu0  ;;  %v4319_v27 = vld [vmem:[#allocation39_spill] sm:$0xff] }
 0x46c   : > { %2060 = vmatprep.subr.mxu0 %v4310_v50  ;;  %2131 = vmatprep.subr.mxu1 %v4311_v63  ;;  %4312 = vst [vmem:[#allocation32_spill] sm:$0xff] %v3778_v0  ;;  %v3780_v60 = vpop.f32.mrf.mxu1  ;;  %v1423_v63 = vld [vmem:[%s4046_s4] sm:$0xf]  ;;  %v4320_v55 = vsub.s32 0, %v4319_v27 }
 0x46d   : > { %4313 = vst [vmem:[#allocation33_spill] sm:$0xff] %v3780_v60  ;;  %v3782_v48 = vpop.f32.mrf.mxu0 }
 0x46e   : > { %4314 = vst [vmem:[#allocation34_spill] sm:$0xff] %v3782_v48  ;;  %v3784_v1 = vpop.f32.mrf.mxu1  ;;  %v3797_v2 = vrot.slane %v1423_v63, %v4320_v55 }
 0x46f   : > { %4315 = vst [vmem:[#allocation35_spill] sm:$0xff] %v3784_v1  ;;  %v3786_v57 = vpop.f32.mrf.mxu0  ;;  %v4324_v1 = vsub.s32 1, %v4319_v27 }
 0x470   : > { %4316 = vst [vmem:[#allocation36_spill] sm:$0xff] %v3786_v57  ;;  %v3788_v3 = vpop.f32.mrf.mxu1  ;;  %4321 = vst [vmem:[#allocation43_spill] sm:$0xff] %v3797_v2  ;;  %v1512_v51 = vadd.f32 %v1511_v49, %v3797_v2 }
 0x471   : > { %4317 = vst [vmem:[#allocation37_spill] sm:$0xff] %v3788_v3  ;;  %v3793_v50 = vpop.f32.mrf.mxu0  ;;  %v3805_v48 = vrot.slane %v1423_v63, %v4324_v1  ;;  %v4328_v1 = vsub.s32 3, %v4319_v27 }
 0x472   : > { %4318 = vst [vmem:[#allocation38_spill] sm:$0xff] %v3793_v50  ;;  %v3799_v0 = vpop.f32.mrf.mxu1 }
 0x473   : > { %4322 = vst [vmem:[#allocation45_spill] sm:$0xff] %v3799_v0  ;;  %v1514_v50 = vadd.f32 %v1513_v54, %v3805_v48  ;;  %v3817_v43 = vrot.slane %v1423_v63, %v4328_v1 }
 0x475   : > { %4329 = vst [vmem:[#allocation49_spill] sm:$0xff] %v3817_v43  ;;  %v1603_v49 = vadd.f32 %v1602_v58, %v3817_v43  ;;  %v1707_v58 = vld [vmem:[#allocation5] sm:$0xff] }
 0x507   : > { %v3801_v60 = vpop.f32.mrf.mxu0  ;;  %v3807_v57 = vpop.f32.mrf.mxu1 }
 0x508   : > { %4323 = vst [vmem:[#allocation48_spill] sm:$0xff] %v3801_v60  ;;  %4325 = vst [vmem:[#allocation46_spill] sm:$0xff] %v3807_v57 }
 0x509   : > { %v3809_v3 = vpop.f32.mrf.mxu0  ;;  %v3813_v47 = vpop.f32.mrf.mxu1 }
 0x50a   : > { %4326 = vst [vmem:[#allocation52_spill] sm:$0xff] %v3809_v3  ;;  %4327 = vst [vmem:[#allocation47_spill] sm:$0xff] %v3813_v47  ;;  %v4330_v3 = vsub.s32 2, %v4319_v27 }
 0x50b   : > { %v1778_v9 = vpop.f32.mrf.mxu0  ;;  %v1849_v60 = vpop.f32.mrf.mxu1 }
 0x50c   : > { %v1854_v55 = vadd.f32 %v1778_v9, %v1512_v51  ;;  %v3822_v54 = vrot.slane %v1423_v63, %v4330_v3 }
 0x50d   : > { %v1780_v46 = vpop.f32.mrf.mxu0  ;;  %v1851_v57 = vpop.f32.mrf.mxu1 }
 0x50e   : > { %v2590_v0 = vmul.f32 -1.442695, %v1854_v55  ;;  %v1855_v52 = vadd.f32 %v1780_v46, %v1514_v50  ;;  %v1857_v47 = vadd.f32 %v1851_v57, %v1603_v49  ;;  %v1601_v9 = vadd.f32 %v1600_v44, %v3822_v54 }
 0x510   : > { %2759 = vpow2.f32 %v2590_v0  ;;  %v2591_v45 = vmul.f32 -1.442695, %v1855_v52  ;;  %v2592_v51 = vmul.f32 -1.442695, %v1857_v47  ;;  %v1856_v0 = vadd.f32 %v1849_v60, %v1601_v9  ;;  %v4332_v9 = vld [vmem:[#allocation19_spill] sm:$0xff] }
 0x512   : > { %2761 = vpow2.f32 %v2591_v45 }
 0x513   : > { %2763 = vpow2.f32 %v2592_v51  ;;  %v4333_v51 = vld [vmem:[#allocation20_spill] sm:$0xff] }
 0x51d   : > { %v2760_v46 = vpop.eup %2759 }
 0x51e   : > { %v1861_v50 = vadd.f32 1.0, %v2760_v46  ;;  %v4334_v46 = vld [vmem:[#allocation21_spill] sm:$0xff] }
 0x51f   : > { %v2762_v52 = vpop.eup %2761 }
 0x520   : > { %2765 = vrcp.f32 %v1861_v50  ;;  %v1867_v55 = vadd.f32 1.0, %v2762_v52  ;;  %v2764_v45 = vpop.eup %2763  ;;  %v4336_v50 = vld [vmem:[#allocation14_spill] sm:$0xff]  ;;  %v4337_v52 = vld [vmem:[#allocation40_spill] sm:$0xff] }
 0x521   : > { %2767 = vtanh.f32 %v1856_v0  ;;  %v1874_v63 = vadd.f32 1.0, %v2764_v45  ;;  %v4335_v0 = vld [vmem:[#allocation13_spill] sm:$0xff]  ;;  %v4339_v45 = vld [vmem:[#allocation44_spill] sm:$0xff] }
 0x522   : > { %2769 = vrcp.f32 %v1867_v55  ;;  %v4338_v55 = vld [vmem:[#allocation41_spill] sm:$0xff] }
 0x523   : > { %2771 = vrcp.f32 %v1874_v63  ;;  %v4343_v63 = vld [vmem:[#allocation24_spill] sm:$0xff] }
 0x52d   : > { %v2766_v1 = vpop.eup %2765 }
 0x52e   : > { %v2768_v43 = vpop.eup %2767 }
 0x52f   : > { %v2770_v27 = vpop.eup %2769  ;;  %v1878_v3 = vmul.f32 %v2768_v43, %v2766_v1  ;;  %v4331_v43 = vld [vmem:[#allocation18_spill] sm:$0xff] }
 0x530   : > { %v1877_v57 = vmul.f32 %v2770_v27, %v1707_v58  ;;  %v2772_v47 = vpop.eup %2771  ;;  %v4340_v1 = vld [vmem:[#allocation42_spill] sm:$0xff]  ;;  %v4342_v27 = vld [vmem:[#allocation23_spill] sm:$0xff] }
 0x531   : > { %v4341_v58 = vld [vmem:[#allocation22_spill] sm:$0xff] }
 0x532   : > { %v3825_v49 = vadd.f32 %v1878_v3, %v1877_v57  ;;  %v4344_v3 = vld [vmem:[#allocation25_spill] sm:$0xff]  ;;  %v4345_v57 = vld [vmem:[#allocation26_spill] sm:$0xff] }
 0x534   : > { %2773 = vtanh.f32 %v3825_v49 }
 0x541   : > { %v2774_v44 = vpop.eup %2773 }
 0x542   : > { %v1881_v60 = vmul.f32 %v2774_v44, %v2772_v47  ;;  %v4346_v47 = vld [vmem:[#allocation27_spill] sm:$0xff]  ;;  %v4347_v44 = vld [vmem:[#allocation28_spill] sm:$0xff] }
 0x544   : > { %1951 = vmatmul.mubr.f32.vlgmr.msra.gmra.mxu0 %v1881_v60  ;;  %2022 = vmatmul.mubr.f32.vlgmr.msra.gmra.mxu1 %v1881_v60  ;;  %v4348_v60 = vld [vmem:[#allocation29_spill] sm:$0xff] }
 0x545   : > { %2061 = vmatpush1.msra.mxu0 %v3517_v62  ;;  %2132 = vmatpush1.msra.mxu1 %v3519_v6 }
 0x546   : > { %2062 = vmatprep.subr.mxu0 %v3523_v5  ;;  %2133 = vmatprep.subr.mxu1 %v3525_v7 }
 0x547   : > { %2063 = vmatpush1.msra.mxu0 %v3529_v56  ;;  %2134 = vmatpush1.msra.mxu1 %v3531_v4 }
 0x548   : > { %2064 = vmatprep.subr.mxu0 %v3535_v61  ;;  %2135 = vmatprep.subr.mxu1 %v3537_v59 }
 0x549   : > { %2065 = vmatpush1.msra.mxu0 %v3541_v53  ;;  %2136 = vmatpush1.msra.mxu1 %v3543_v8 }
 0x54a   : > { %2066 = vmatprep.subr.mxu0 %v3547_v10  ;;  %2137 = vmatprep.subr.mxu1 %v3549_v11 }
 0x54b   : > { %2067 = vmatpush1.msra.mxu0 %v3553_v12  ;;  %2138 = vmatpush1.msra.mxu1 %v3555_v13 }
 0x54c   : > { %2068 = vmatprep.subr.mxu0 %v3559_v14  ;;  %2139 = vmatprep.subr.mxu1 %v3561_v15 }
 0x54d   : > { %2069 = vmatpush1.msra.mxu0 %v3565_v16  ;;  %2140 = vmatpush1.msra.mxu1 %v3567_v17 }
 0x54e   : > { %2070 = vmatprep.subr.mxu0 %v3571_v18  ;;  %2141 = vmatprep.subr.mxu1 %v3573_v19 }
 0x54f   : > { %2071 = vmatpush1.msra.mxu0 %v3577_v20  ;;  %2142 = vmatpush1.msra.mxu1 %v3579_v21 }
 0x550   : > { %2072 = vmatprep.subr.mxu0 %v3583_v22  ;;  %2143 = vmatprep.subr.mxu1 %v3585_v23 }
 0x551   : > { %2073 = vmatpush1.msra.mxu0 %v3589_v24  ;;  %2144 = vmatpush1.msra.mxu1 %v3591_v25 }
 0x552   : > { %2074 = vmatprep.subr.mxu0 %v3595_v26  ;;  %2145 = vmatprep.subr.mxu1 %v3597_v28 }
 0x553   : > { %2075 = vmatpush1.msra.mxu0 %v3599_v29  ;;  %2146 = vmatpush1.msra.mxu1 %v3603_v30 }
 0x554   : > { %2076 = vmatprep.subr.mxu0 %v3605_v31  ;;  %2147 = vmatprep.subr.mxu1 %v3607_v32 }
 0x555   : > { %2077 = vmatpush1.msra.mxu0 %v3611_v33  ;;  %2148 = vmatpush1.msra.mxu1 %v3613_v34 }
 0x556   : > { %2078 = vmatprep.subr.mxu0 %v3615_v35  ;;  %2149 = vmatprep.subr.mxu1 %v3619_v36 }
 0x557   : > { %2079 = vmatpush1.msra.mxu0 %v3621_v37  ;;  %2150 = vmatpush1.msra.mxu1 %v3623_v38 }
 0x558   : > { %2080 = vmatprep.subr.mxu0 %v3627_v39  ;;  %2151 = vmatprep.subr.mxu1 %v3629_v40 }
 0x559   : > { %2081 = vmatpush1.msra.mxu0 %v3633_v41  ;;  %2152 = vmatpush1.msra.mxu1 %v3635_v42 }
 0x55a   : > { %2082 = vmatprep.subr.mxu0 %v4331_v43  ;;  %2153 = vmatprep.subr.mxu1 %v4332_v9  ;;  %v4358_v9 = vld [vmem:[#allocation33_spill] sm:$0xff] }
 0x55b   : > { %2083 = vmatpush1.msra.mxu0 %v4333_v51  ;;  %2154 = vmatpush1.msra.mxu1 %v4334_v46  ;;  %v4356_v46 = vld [vmem:[#allocation49_spill] sm:$0xff] }
 0x55c   : > { %2084 = vmatprep.subr.mxu0 %v4335_v0  ;;  %2155 = vmatprep.subr.mxu1 %v4336_v50 }
 0x55d   : > { %2085 = vmatpush1.msra.mxu0 %v4337_v52  ;;  %2156 = vmatpush1.msra.mxu1 %v4338_v55  ;;  %v4349_v55 = vld [vmem:[#allocation30_spill] sm:$0xff] }
 0x55e   : > { %2086 = vmatprep.subr.mxu0 %v4339_v45  ;;  %2157 = vmatprep.subr.mxu1 %v4340_v1  ;;  %v4350_v45 = vmov 0.0   ;;  %v4351_v1 = vld [vmem:[#allocation31_spill] sm:$0xff] }
 0x55f   : > { %2087 = vmatpush1.msra.mxu0 %v4341_v58  ;;  %2158 = vmatpush1.msra.mxu1 %v4342_v27  ;;  %v4352_v27 = vld [vmem:[#allocation15_spill] sm:$0xff] }
 0x560   : > { %2088 = vmatprep.subr.mxu0 %v4343_v63  ;;  %2159 = vmatprep.subr.mxu1 %v4344_v3  ;;  %v4353_v63 = vld [vmem:[#allocation16_spill] sm:$0xff] }
 0x561   : > { %2089 = vmatpush1.msra.mxu0 %v4345_v57  ;;  %2160 = vmatpush1.msra.mxu1 %v4346_v47  ;;  %v4354_v57 = vld [vmem:[#allocation32_spill] sm:$0xff] }
 0x562   : > { %2090 = vmatprep.subr.mxu0 %v4347_v44  ;;  %2161 = vmatprep.subr.mxu1 %v4348_v60  ;;  %v1518_v3 = vadd.f32 %v4354_v57, %v3797_v2  ;;  %v4355_v44 = vld [vmem:[#allocation34_spill] sm:$0xff]  ;;  %v1607_v57 = vadd.f32 %v4358_v9, %v3822_v54 }
 0x563   : > { %2091 = vmatpush1.msra.mxu0 %v4349_v55  ;;  %2124 = vmatprep.mubr.f32.mxu0 %v4350_v45  ;;  %v1520_v58 = vadd.f32 %v4355_v44, %v3805_v48 }
 0x564   : > { %2162 = vmatpush1.msra.mxu1 %v4351_v1  ;;  %2195 = vmatprep.mubr.f32.mxu1 %v4350_v45 }
 0x565   : > { %2234 = vmatprep.subr.mxu0 %v4352_v27  ;;  %2305 = vmatprep.subr.mxu1 %v4353_v63  ;;  %v4357_v27 = vld [vmem:[#allocation35_spill] sm:$0xff] }
 0x566   : > { %v1609_v51 = vadd.f32 %v4357_v27, %v4356_v46 }
 0x604   : > { %v1952_v47 = vpop.f32.mrf.mxu0  ;;  %v2023_v0 = vpop.f32.mrf.mxu1 }
 0x605   : > { %v2028_v60 = vadd.f32 %v1952_v47, %v1518_v3  ;;  %v2030_v2 = vadd.f32 %v2023_v0, %v1607_v57 }
 0x606   : > { %v1954_v52 = vpop.f32.mrf.mxu0  ;;  %v2025_v45 = vpop.f32.mrf.mxu1 }
 0x607   : > { %v2593_v55 = vmul.f32 -1.442695, %v2028_v60  ;;  %v2029_v50 = vadd.f32 %v1954_v52, %v1520_v58  ;;  %v2031_v63 = vadd.f32 %v2025_v45, %v1609_v51 }
 0x609   : > { %2775 = vpow2.f32 %v2593_v55  ;;  %v2594_v1 = vmul.f32 -1.442695, %v2029_v50  ;;  %v2595_v43 = vmul.f32 -1.442695, %v2031_v63 }
 0x60b   : > { %2777 = vpow2.f32 %v2594_v1 }
 0x60c   : > { %2779 = vtanh.f32 %v2030_v2 }
 0x60d   : > { %2781 = vpow2.f32 %v2595_v43 }
 0x616   : > { %v2776_v42 = vpop.eup %2775 }
 0x617   : > { %v2035_v44 = vadd.f32 1.0, %v2776_v42 }
 0x618   : > { %v2778_v3 = vpop.eup %2777 }
 0x619   : > { %2783 = vrcp.f32 %v2035_v44  ;;  %v2041_v52 = vadd.f32 1.0, %v2778_v3  ;;  %v2780_v50 = vpop.eup %2779 }
 0x61a   : > { %v2782_v55 = vpop.eup %2781 }
 0x61b   : > { %2785 = vrcp.f32 %v2041_v52  ;;  %v2048_v60 = vadd.f32 1.0, %v2782_v55 }
 0x61d   : > { %2787 = vrcp.f32 %v2048_v60 }
 0x626   : > { %v2784_v1 = vpop.eup %2783 }
 0x627   : > { %v2052_v58 = vmul.f32 %v2784_v1, %v2780_v50 }
 0x628   : > { %v2786_v47 = vpop.eup %2785 }
 0x629   : > { %v2051_v51 = vmul.f32 %v2786_v47, %v3825_v49 }
 0x62a   : > { %v2788_v42 = vpop.eup %2787 }
 0x62b   : > { %v3903_v45 = vadd.f32 %v2052_v58, %v2051_v51 }
 0x62d   : > { %2789 = vtanh.f32 %v3903_v45 }
 0x63a   : > { %v2790_v2 = vpop.eup %2789 }
 0x63b   : > { %v2055_v9 = vmul.f32 %v2790_v2, %v2788_v42  ;;  %v4386_v42 = vld [vmem:[#allocation48_spill] sm:$0xff] }
 0x63d   : > { %2125 = vmatmul.mubr.f32.vlgmr.msra.gmra.mxu0 %v2055_v9  ;;  %2196 = vmatmul.mubr.f32.vlgmr.msra.gmra.mxu1 %v2055_v9 }
 0x63e   : > { %2235 = vmatpush1.msra.mxu0 %v3517_v62  ;;  %2306 = vmatpush1.msra.mxu1 %v3519_v6  ;;  %v4359_v62 = vld [vmem:[#allocation17_spill] sm:$0xff]  ;;  %v4360_v6 = vld [vmem:[#allocation18_spill] sm:$0xff] }
 0x63f   : > { %2236 = vmatprep.subr.mxu0 %v3523_v5  ;;  %2307 = vmatprep.subr.mxu1 %v3525_v7  ;;  %v4361_v5 = vld [vmem:[#allocation19_spill] sm:$0xff]  ;;  %v4362_v7 = vld [vmem:[#allocation20_spill] sm:$0xff] }
 0x640   : > { %2237 = vmatpush1.msra.mxu0 %v3529_v56  ;;  %2308 = vmatpush1.msra.mxu1 %v3531_v4  ;;  %v4363_v56 = vld [vmem:[#allocation21_spill] sm:$0xff] }
 0x641   : > { %2238 = vmatprep.subr.mxu0 %v3535_v61  ;;  %2309 = vmatprep.subr.mxu1 %v3537_v59  ;;  %v4364_v4 = vld [vmem:[#allocation13_spill] sm:$0xff]  ;;  %v4365_v61 = vld [vmem:[#allocation14_spill] sm:$0xff]  ;;  %v4366_v59 = vld [vmem:[#allocation40_spill] sm:$0xff] }
 0x642   : > { %2239 = vmatpush1.msra.mxu0 %v3541_v53  ;;  %2310 = vmatpush1.msra.mxu1 %v3543_v8  ;;  %v4367_v53 = vld [vmem:[#allocation41_spill] sm:$0xff]  ;;  %v4368_v8 = vld [vmem:[#allocation44_spill] sm:$0xff] }
 0x643   : > { %2240 = vmatprep.subr.mxu0 %v3547_v10  ;;  %2311 = vmatprep.subr.mxu1 %v3549_v11  ;;  %v4369_v10 = vld [vmem:[#allocation42_spill] sm:$0xff] }
 0x644   : > { %2241 = vmatpush1.msra.mxu0 %v3553_v12  ;;  %2312 = vmatpush1.msra.mxu1 %v3555_v13  ;;  %v4370_v11 = vld [vmem:[#allocation22_spill] sm:$0xff]  ;;  %v4371_v12 = vld [vmem:[#allocation23_spill] sm:$0xff]  ;;  %v4372_v13 = vld [vmem:[#allocation24_spill] sm:$0xff] }
 0x645   : > { %2242 = vmatprep.subr.mxu0 %v3559_v14  ;;  %2313 = vmatprep.subr.mxu1 %v3561_v15  ;;  %v4373_v14 = vld [vmem:[#allocation25_spill] sm:$0xff]  ;;  %v4374_v15 = vld [vmem:[#allocation26_spill] sm:$0xff] }
 0x646   : > { %2243 = vmatpush1.msra.mxu0 %v3565_v16  ;;  %2314 = vmatpush1.msra.mxu1 %v3567_v17  ;;  %v4375_v16 = vld [vmem:[#allocation27_spill] sm:$0xff]  ;;  %v4376_v17 = vld [vmem:[#allocation28_spill] sm:$0xff] }
 0x647   : > { %2244 = vmatprep.subr.mxu0 %v3571_v18  ;;  %2315 = vmatprep.subr.mxu1 %v3573_v19  ;;  %v4377_v18 = vld [vmem:[#allocation29_spill] sm:$0xff]  ;;  %v4378_v19 = vld [vmem:[#allocation30_spill] sm:$0xff] }
 0x648   : > { %2245 = vmatpush1.msra.mxu0 %v3577_v20  ;;  %2316 = vmatpush1.msra.mxu1 %v3579_v21  ;;  %v4379_v20 = vmov 0.0   ;;  %v4380_v21 = vld [vmem:[#allocation31_spill] sm:$0xff] }
 0x649   : > { %2246 = vmatprep.subr.mxu0 %v3583_v22  ;;  %2317 = vmatprep.subr.mxu1 %v3585_v23  ;;  %v4381_v22 = vld [vmem:[#allocation43_spill] sm:$0xff]  ;;  %v4382_v23 = vld [vmem:[#allocation36_spill] sm:$0xff] }
 0x64a   : > { %2247 = vmatpush1.msra.mxu0 %v3589_v24  ;;  %2318 = vmatpush1.msra.mxu1 %v3591_v25  ;;  %v1524_v24 = vadd.f32 %v4382_v23, %v4381_v22  ;;  %v1530_v2 = vadd.f32 %v4386_v42, %v4381_v22 }
 0x64b   : > { %2248 = vmatprep.subr.mxu0 %v3595_v26  ;;  %2319 = vmatprep.subr.mxu1 %v3597_v28  ;;  %v4383_v26 = vld [vmem:[#allocation38_spill] sm:$0xff] }
 0x64c   : > { %2249 = vmatpush1.msra.mxu0 %v3599_v29  ;;  %2320 = vmatpush1.msra.mxu1 %v3603_v30  ;;  %v1526_v28 = vadd.f32 %v4383_v26, %v3805_v48 }
 0x64d   : > { %2250 = vmatprep.subr.mxu0 %v3605_v31  ;;  %2321 = vmatprep.subr.mxu1 %v3607_v32 }
 0x64e   : > { %2251 = vmatpush1.msra.mxu0 %v3611_v33  ;;  %2322 = vmatpush1.msra.mxu1 %v3613_v34 }
 0x64f   : > { %2252 = vmatprep.subr.mxu0 %v3615_v35  ;;  %2323 = vmatprep.subr.mxu1 %v3619_v36  ;;  %v4384_v36 = vld [vmem:[#allocation45_spill] sm:$0xff] }
 0x650   : > { %2253 = vmatpush1.msra.mxu0 %v3621_v37  ;;  %2324 = vmatpush1.msra.mxu1 %v3623_v38  ;;  %v1615_v37 = vadd.f32 %v4384_v36, %v4356_v46 }
 0x651   : > { %2254 = vmatprep.subr.mxu0 %v3627_v39  ;;  %2325 = vmatprep.subr.mxu1 %v3629_v40  ;;  %v4385_v39 = vld [vmem:[#allocation37_spill] sm:$0xff] }
 0x652   : > { %2255 = vmatpush1.msra.mxu0 %v3633_v41  ;;  %2326 = vmatpush1.msra.mxu1 %v4359_v62  ;;  %v1613_v40 = vadd.f32 %v4385_v39, %v3822_v54  ;;  %v4387_v62 = vld [vmem:[#allocation52_spill] sm:$0xff] }
 0x653   : > { %2256 = vmatprep.subr.mxu0 %v4360_v6  ;;  %2327 = vmatprep.subr.mxu1 %v4361_v5  ;;  %v1532_v6 = vadd.f32 %v4387_v62, %v3805_v48 }
 0x654   : > { %2257 = vmatpush1.msra.mxu0 %v4362_v7  ;;  %2328 = vmatpush1.msra.mxu1 %v4363_v56 }
 0x655   : > { %2258 = vmatprep.subr.mxu0 %v4364_v4  ;;  %2329 = vmatprep.subr.mxu1 %v4365_v61 }
 0x656   : > { %2259 = vmatpush1.msra.mxu0 %v4366_v59  ;;  %2330 = vmatpush1.msra.mxu1 %v4367_v53  ;;  %v4388_v53 = vld [vmem:[#allocation47_spill] sm:$0xff] }
 0x657   : > { %2260 = vmatprep.subr.mxu0 %v4368_v8  ;;  %2331 = vmatprep.subr.mxu1 %v4369_v10  ;;  %v1621_v8 = vadd.f32 %v4388_v53, %v4356_v46 }
 0x658   : > { %2261 = vmatpush1.msra.mxu0 %v4370_v11  ;;  %2332 = vmatpush1.msra.mxu1 %v4371_v12  ;;  %v4389_v11 = vld [vmem:[#allocation46_spill] sm:$0xff] }
 0x659   : > { %2262 = vmatprep.subr.mxu0 %v4372_v13  ;;  %2333 = vmatprep.subr.mxu1 %v4373_v14  ;;  %v1619_v12 = vadd.f32 %v4389_v11, %v3822_v54 }
 0x65a   : > { %2263 = vmatpush1.msra.mxu0 %v4374_v15  ;;  %2334 = vmatpush1.msra.mxu1 %v4375_v16 }
 0x65b   : > { %2264 = vmatprep.subr.mxu0 %v4376_v17  ;;  %2335 = vmatprep.subr.mxu1 %v4377_v18 }
 0x65c   : > { %2265 = vmatpush1.msra.mxu0 %v4378_v19  ;;  %2298 = vmatprep.mubr.f32.mxu0 %v4379_v20 }
 0x65d   : > { %2336 = vmatpush1.msra.mxu1 %v4380_v21  ;;  %2369 = vmatprep.mubr.f32.mxu1 %v4379_v20 }
 0x6fd   : > { %v2126_v25 = vpop.f32.mrf.mxu0  ;;  %v2197_v33 = vpop.f32.mrf.mxu1 }
 0x6fe   : > { %v2202_v29 = vadd.f32 %v2126_v25, %v1524_v24  ;;  %v2204_v41 = vadd.f32 %v2197_v33, %v1613_v40 }
 0x6ff   : > { %v2128_v30 = vpop.f32.mrf.mxu0  ;;  %v2199_v35 = vpop.f32.mrf.mxu1 }
 0x700   : > { %v2596_v31 = vmul.f32 -1.442695, %v2202_v29  ;;  %v2203_v32 = vadd.f32 %v2128_v30, %v1526_v28  ;;  %v2205_v38 = vadd.f32 %v2199_v35, %v1615_v37 }
 0x702   : > { %2791 = vpow2.f32 %v2596_v31  ;;  %v2597_v34 = vmul.f32 -1.442695, %v2203_v32  ;;  %v2598_v49 = vmul.f32 -1.442695, %v2205_v38 }
 0x704   : > { %2793 = vpow2.f32 %v2597_v34 }
 0x705   : > { %2795 = vtanh.f32 %v2204_v41 }
 0x706   : > { %2797 = vpow2.f32 %v2598_v49 }
 0x70f   : > { %v2792_v43 = vpop.eup %2791 }
 0x710   : > { %v2209_v0 = vadd.f32 1.0, %v2792_v43 }
 0x711   : > { %v2794_v27 = vpop.eup %2793 }
 0x712   : > { %2799 = vrcp.f32 %v2209_v0  ;;  %v2215_v63 = vadd.f32 1.0, %v2794_v27  ;;  %v2796_v57 = vpop.eup %2795 }
 0x713   : > { %v2798_v44 = vpop.eup %2797 }
 0x714   : > { %2801 = vrcp.f32 %v2215_v63  ;;  %v2222_v55 = vadd.f32 1.0, %v2798_v44 }
 0x716   : > { %2803 = vrcp.f32 %v2222_v55 }
 0x71f   : > { %v2800_v3 = vpop.eup %2799 }
 0x720   : > { %v2226_v52 = vmul.f32 %v2800_v3, %v2796_v57 }
 0x721   : > { %v2802_v50 = vpop.eup %2801 }
 0x722   : > { %v2225_v1 = vmul.f32 %v2802_v50, %v3903_v45 }
 0x723   : > { %v2804_v47 = vpop.eup %2803 }
 0x724   : > { %v2227_v58 = vadd.f32 %v2226_v52, %v2225_v1 }
 0x726   : > { %2805 = vtanh.f32 %v2227_v58 }
 0x733   : > { %v2806_v60 = vpop.eup %2805 }
 0x734   : > { %v2229_v51 = vmul.f32 %v2806_v60, %v2804_v47 }
 0x736   : > { %2299 = vmatmul.mubr.f32.vlgmr.msra.gmra.mxu0 %v2229_v51  ;;  %2370 = vmatmul.mubr.f32.vlgmr.msra.gmra.mxu1 %v2229_v51 }
 0x7f6   : > { %v2300_v9 = vpop.f32.mrf.mxu0  ;;  %v2371_v45 = vpop.f32.mrf.mxu1 }
 0x7f7   : > { %v2376_v5 = vadd.f32 %v2300_v9, %v1530_v2  ;;  %v2378_v13 = vadd.f32 %v2371_v45, %v1619_v12 }
 0x7f8   : > { %v2302_v7 = vpop.f32.mrf.mxu0  ;;  %v2373_v59 = vpop.f32.mrf.mxu1 }
 0x7f9   : > { %v2599_v56 = vmul.f32 -1.442695, %v2376_v5  ;;  %v2377_v4 = vadd.f32 %v2302_v7, %v1532_v6  ;;  %v2379_v10 = vadd.f32 %v2373_v59, %v1621_v8 }
 0x7fb   : > { %2807 = vpow2.f32 %v2599_v56  ;;  %v2600_v61 = vmul.f32 -1.442695, %v2377_v4  ;;  %v2601_v14 = vmul.f32 -1.442695, %v2379_v10 }
 0x7fd   : > { %2809 = vpow2.f32 %v2600_v61 }
 0x7fe   : > { %2811 = vtanh.f32 %v2378_v13 }
 0x7ff   : > { %2813 = vpow2.f32 %v2601_v14 }
 0x808   : > { %v2808_v15 = vpop.eup %2807 }
 0x809   : > { %v2383_v48 = vadd.f32 1.0, %v2808_v15 }
 0x80a   : > { %v2810_v16 = vpop.eup %2809 }
 0x80b   : > { %2815 = vrcp.f32 %v2383_v48  ;;  %v2389_v17 = vadd.f32 1.0, %v2810_v16  ;;  %v2812_v18 = vpop.eup %2811 }
 0x80c   : > { %v2814_v19 = vpop.eup %2813 }
 0x80d   : > { %2817 = vrcp.f32 %v2389_v17  ;;  %v2396_v46 = vadd.f32 1.0, %v2814_v19 }
 0x80f   : > { %2819 = vrcp.f32 %v2396_v46 }
 0x818   : > { %v2816_v20 = vpop.eup %2815 }
 0x819   : > { %v2400_v21 = vmul.f32 %v2816_v20, %v2812_v18 }
 0x81a   : > { %v2818_v22 = vpop.eup %2817 }
 0x81b   : > { %v2399_v23 = vmul.f32 %v2818_v22, %v2227_v58 }
 0x81c   : > { %v2820_v54 = vpop.eup %2819 }
 0x81d   : > { %v2401_v24 = vadd.f32 %v2400_v21, %v2399_v23 }
 0x81f   : > { %2821 = vtanh.f32 %v2401_v24  ;;  %2405 = vst [vmem:[#allocation5] sm:$0xff] %v2401_v24 }
 0x82b   : > { %2409 = sbr.rel (%p2602_p4) target bundleno = 2325 (0x915), region = 68 }
 0x82c   : > { %v2822_v25 = vpop.eup %2821 }
 0x82d   : > { %v2403_v26 = vmul.f32 %v2822_v25, %v2820_v54 }
 0x82f   : > { %2404 = vst [vmem:[#allocation4 + $0x8] sm:$0xff] %v2403_v26 }
 0x830   : > { %v2425_v28 = vld [vmem:[%s4048_s6 + $0x78] sm:$0xff]  ;;  %v2897_v29 = vmov 0.0   ;;  %v2424_v30 = vld [vmem:[%s4048_s6 + $0x70] sm:$0xff]  ;;  %vm2898_vm2 = vmmov 0   ;;  %v2423_v31 = vld [vmem:[%s4048_s6 + $0x68] sm:$0xff]  ;;  %vm2503_vm3 = vcmask 7168  }
 0x831   : > { %2623 = vmatprep.subr.mxu0 %v2897_v29  ;;  %2655 = vmatprep.mubr.msk.f32.mxu0 %vm2898_vm2, %v2897_v29  ;;  %v2422_v32 = vld [vmem:[%s4048_s6 + $0x60] sm:$0xff]  ;;  %v2421_v33 = vld [vmem:[%s4048_s6 + $0x58] sm:$0xff]  ;;  %v2420_v34 = vld [vmem:[%s4048_s6 + $0x50] sm:$0xff] }
 0x832   : > { %2624 = vmatpush3.msra.mxu0 %v2425_v28  ;;  %v2419_v35 = vld [vmem:[%s4048_s6 + $0x48] sm:$0xff]  ;;  %v2418_v36 = vld [vmem:[%s4048_s6 + $0x40] sm:$0xff]  ;;  %v2417_v37 = vld [vmem:[%s4048_s6 + $0x38] sm:$0xff] }
 0x833   : > { %2625 = vmatprep.subr.mxu0 %v2897_v29  ;;  %v2416_v38 = vld [vmem:[%s4048_s6 + $0x30] sm:$0xff]  ;;  %v2415_v39 = vld [vmem:[%s4048_s6 + $0x28] sm:$0xff]  ;;  %v2414_v40 = vld [vmem:[%s4048_s6 + $0x20] sm:$0xff] }
 0x834   : > { %2626 = vmatpush3.msra.mxu0 %v2424_v30  ;;  %v2413_v41 = vld [vmem:[%s4048_s6 + $0x18] sm:$0xff]  ;;  %v2412_v49 = vld [vmem:[%s4048_s6 + $0x10] sm:$0xff]  ;;  %v2411_v43 = vld [vmem:[%s4048_s6 + $0x8] sm:$0xff] }
 0x835   : > { %2627 = vmatprep.subr.mxu0 %v2897_v29  ;;  %v2410_v0 = vld [vmem:[%s4048_s6] sm:$0xff] }
 0x836   : > { %2628 = vmatpush3.msra.mxu0 %v2423_v31  ;;  %v2603_v27 = vld [vmem:[#allocation6] ss:$0 sm:$0xff] }
 0x837   : > { %2629 = vmatprep.subr.mxu0 %v2897_v29 }
 0x838   : > { %2630 = vmatpush3.msra.mxu0 %v2422_v32 }
 0x839   : > { %2631 = vmatprep.subr.mxu0 %v2897_v29 }
 0x83a   : > { %2632 = vmatpush3.msra.mxu0 %v2421_v33 }
 0x83b   : > { %2633 = vmatprep.subr.mxu0 %v2897_v29 }
 0x83c   : > { %2634 = vmatpush3.msra.mxu0 %v2420_v34 }
 0x83d   : > { %2635 = vmatprep.subr.mxu0 %v2897_v29 }
 0x83e   : > { %2636 = vmatpush3.msra.mxu0 %v2419_v35 }
 0x83f   : > { %2637 = vmatprep.subr.mxu0 %v2897_v29 }
 0x840   : > { %2638 = vmatpush3.msra.mxu0 %v2418_v36 }
 0x841   : > { %2639 = vmatprep.subr.mxu0 %v2897_v29 }
 0x842   : > { %2640 = vmatpush3.msra.mxu0 %v2417_v37 }
 0x843   : > { %2641 = vmatprep.subr.mxu0 %v2897_v29 }
 0x844   : > { %2642 = vmatpush3.msra.mxu0 %v2416_v38 }
 0x845   : > { %2643 = vmatprep.subr.mxu0 %v2897_v29 }
 0x846   : > { %2644 = vmatpush3.msra.mxu0 %v2415_v39 }
 0x847   : > { %2645 = vmatprep.subr.mxu0 %v2897_v29 }
 0x848   : > { %2646 = vmatpush3.msra.mxu0 %v2414_v40 }
 0x849   : > { %2647 = vmatprep.subr.mxu0 %v2897_v29 }
 0x84a   : > { %2648 = vmatpush3.msra.mxu0 %v2413_v41 }
 0x84b   : > { %2649 = vmatprep.subr.mxu0 %v2897_v29 }
 0x84c   : > { %2650 = vmatpush3.msra.mxu0 %v2412_v49 }
 0x84d   : > { %2651 = vmatprep.subr.mxu0 %v2897_v29 }
 0x84e   : > { %2652 = vmatpush3.msra.mxu0 %v2411_v43 }
 0x84f   : > { %2653 = vmatprep.subr.mxu0 %v2897_v29 }
 0x850   : > { %2654 = vmatpush3.msra.mxu0 %v2410_v0 }
 0x851   : > { %2656 = vmatmul.mubr.f32.vlgmr.msra.gmra.mxu0 %v2403_v26 }
 0x911   : > { %v2499_v63 = vpop.f32.mrf.mxu0 }
 0x912   : > { %v2500_v57 = vadd.f32 %v2603_v27, %v2499_v63 }
 0x913   : > { %v2657_v44 = vpop.f32.mrf.mxu0 }
 0x914   : > { %2504 = vst.msk [vmem:[%s4050_s8] sm:$0xff] %vm2503_vm3, %v2500_v57 }
 0x915 PF: > { %s22_s29 = sadd.s32 1, %s2889_s29  }
 0x916   : > { %p19_p6 = scmp.ge.s32.totalorder %s22_s29, 4  }
 0x918   :  { %21 = sbr.rel (!%p19_p6) target bundleno = 5 (0x5), region = 104 }
 0x91d   :  { %2516 = vsyncpa [#allocation8], 1 }
 0x91e   :  { %2518 = vsyncpa [#allocation8 + $0x1], 1 }
 0x91f   :  { %2519 = vsyncpa [#allocation10], 1 }

</bundles_post_ra>
